<compile_context>
chip_gen: v7x
topology: tpu7x:2x2x1
jax: 0.10.0
libtpu: 0.0.40
codegen_flags: <defaults>
</compile_context>

<pallas_src>
import jax
import jax.numpy as jnp
from jax.experimental import pallas as pl
from jax.experimental.pallas import tpu as pltpu

K = 5      # conv kernel size
PAD = 2    # "same" padding
P1 = 8     # pixels packed per matmul row, layer 1 (8 * 16 ch = 128 lanes)
P2 = 4     # pixels packed per matmul row, layer 2 (4 * 32 ch = 128 lanes)
VMEM_LIMIT = 48 * 1024 * 1024   # fits v7x's 64 MiB/TC with headroom


# ----------------------------------------------------------------------------
# Blocking heuristic
# ----------------------------------------------------------------------------
def _pick_block_n(N, H, W):
    """Images per grid step: as large as possible (amortizes the ~0.35us
    per-step pipeline overhead) subject to (a) double-buffered patch tiles
    fitting the 48 MiB VMEM budget and (b) >= 2 grid blocks whenever N >= 2
    so the 'parallel' axis can shard across a megacore's TensorCores."""
    kkc1, kkc2 = K * K * 3, K * K * 16
    per_img = 2 * max(4 * (H // 2) * ((W // 2) // P1) * P1 * kkc1,
                      4 * (H // 4) * ((W // 4) // P2) * P2 * kkc2)   # bf16 bytes
    cap = max(1, min(32, (10 * 1024 * 1024) // per_img))
    best = 1
    for b in range(1, min(N, cap) + 1):
        if N % b == 0 and (N // b >= 2 or N == 1):
            best = b
    return best


# ----------------------------------------------------------------------------
# Wrapper-side layout plumbing: pixel-packed, pooling-phase-major im2col.
# ----------------------------------------------------------------------------
def _im2col_packed(x_nhwc, block_n, P):
    """KxK 'same' patches of an NHWC tensor, packed for lane-dense matmuls.

    Row order:    (n_block, pool_phase, n_in_block, ho, w_group)
    Column order: (p, dy, dx, cin) with p = pixel-within-group
                  (wo = w_group*P + p), matching
                  jnp.kron(eye(P), w_hwio.reshape(K*K*Cin, Cout)).
    """
    N, H, W, C = x_nhwc.shape
    Ho, Wo = H // 2, W // 2
    Wg = Wo // P
    xp = jnp.pad(x_nhwc, ((0, 0), (PAD, PAD), (PAD, PAD), (0, 0)))
    taps = [xp[:, dy:dy + H, dx:dx + W, :] for dy in range(K) for dx in range(K)]
    p = jnp.stack(taps, axis=3).reshape(N, H, W, K * K * C)
    # h -> (ho, ph), w -> (w_group, p, pw)
    p = p.reshape(N // block_n, block_n, Ho, 2, Wg, P, 2, K * K * C)
    p = p.transpose(0, 3, 6, 1, 2, 4, 5, 7)   # (nb, ph, pw, n, ho, wg, p, kkc)
    return p.reshape(N * 4 * Ho * Wg, P * K * K * C)


# ----------------------------------------------------------------------------
# Kernel 1: Conv2d(k=5,p=2) [BN scale folded] + shift + ReLU + MaxPool2d(2)
# ----------------------------------------------------------------------------
def _conv_bn_relu_pool_kernel(p_ref, w_ref, b_ref, o_ref):
    # p_ref: (4*G, P*K*K*Cin) bf16 pixel-packed patches (4 pooling phases)
    # w_ref: (P*K*K*Cin, 128) bf16 block-diagonal weight, BN scale folded in
    # b_ref: (1, 128) f32 folded BN shift (conv bias included), tiled per pixel
    # o_ref: (G, 128) bf16 pooled activations; rows (n, ho, w_group),
    #        cols (pixel, channel) -> unmasked 128-lane stores.
    G = o_ref.shape[0]
    conv = jnp.dot(p_ref[...], w_ref[...], preferred_element_type=jnp.float32)
    pooled = jnp.maximum(jnp.maximum(conv[0 * G:1 * G], conv[1 * G:2 * G]),
                         jnp.maximum(conv[2 * G:3 * G], conv[3 * G:4 * G]))
    # per-channel shift + ReLU commute with the max over pooling phases
    o_ref[...] = jnp.maximum(pooled + b_ref[...], 0.0).astype(o_ref.dtype)


def conv_bn_relu_pool(patches, w_bd, shift_t, *, n_blocks, g_rows):
    Kp = w_bd.shape[0]
    return pl.pallas_call(
        _conv_bn_relu_pool_kernel,
        out_shape=jax.ShapeDtypeStruct((n_blocks * g_rows, 128), jnp.bfloat16),
        grid=(n_blocks,),
        in_specs=[
            pl.BlockSpec((4 * g_rows, Kp), lambda i: (i, 0)),
            pl.BlockSpec((Kp, 128), lambda i: (0, 0)),
            pl.BlockSpec((1, 128), lambda i: (0, 0)),
        ],
        out_specs=pl.BlockSpec((g_rows, 128), lambda i: (i, 0)),
        compiler_params=pltpu.CompilerParams(
            dimension_semantics=("parallel",),
            vmem_limit_bytes=VMEM_LIMIT),
    )(patches, w_bd, shift_t)


# ----------------------------------------------------------------------------
# Kernel 2: layer-2 conv+shift+ReLU+pool fused with Linear(F, 2) + LogSoftmax
# ----------------------------------------------------------------------------
def _conv_pool_fc_lsm_kernel(p_ref, w_ref, b_ref, wt0_ref, wt1_ref, agg_ref,
                             bfc_ref, o_ref):
    # p_ref: (4*G, P*K*K*Cin) bf16; w_ref: (P*K*K*Cin, 128) bf16 block-diag
    # b_ref: (1, 128) f32 folded BN shift, tiled per packed pixel
    # wt0/wt1: (G, 128) f32 per-class FC weights in the packed pooled layout,
    #          pre-tiled per image of the block
    # agg_ref: (B, G) f32 0/1 per-image row aggregator; bfc_ref: (1, 2)
    # o_ref:   (1, B, 2) f32 log-probabilities
    G = wt0_ref.shape[0]
    conv = jnp.dot(p_ref[...], w_ref[...], preferred_element_type=jnp.float32)
    pooled = jnp.maximum(jnp.maximum(conv[0 * G:1 * G], conv[1 * G:2 * G]),
                         jnp.maximum(conv[2 * G:3 * G], conv[3 * G:4 * G]))
    act = jnp.maximum(pooled + b_ref[...], 0.0)              # (G, 128) f32

    # TODO(synk): Dropout(p=0.5) treated as inference-mode identity (no RNG mask).
    # Fused fully connected layer, computed without flattening the activation:
    #   logits[n, o] = sum_{g in image n, c} act[g, c] * wt_o[g, c] + b_o
    s0 = jnp.dot(agg_ref[...], act * wt0_ref[...],
                 preferred_element_type=jnp.float32)          # (B, 128)
    s1 = jnp.dot(agg_ref[...], act * wt1_ref[...],
                 preferred_element_type=jnp.float32)
    l0 = jnp.sum(s0, axis=1, keepdims=True) + bfc_ref[:, 0:1]  # (B, 1)
    l1 = jnp.sum(s1, axis=1, keepdims=True) + bfc_ref[:, 1:2]
    m = jnp.maximum(l0, l1)                                    # 2-class log-softmax
    lse = m + jnp.log(jnp.exp(l0 - m) + jnp.exp(l1 - m))
    o_ref[0, :, 0:1] = l0 - lse
    o_ref[0, :, 1:2] = l1 - lse


def conv_pool_fc_logsoftmax(patches, w_bd, shift_t, wt0, wt1, agg, bfc,
                            *, n_blocks, g_rows, block_n):
    Kp = w_bd.shape[0]
    out = pl.pallas_call(
        _conv_pool_fc_lsm_kernel,
        out_shape=jax.ShapeDtypeStruct((n_blocks, block_n, 2), jnp.float32),
        grid=(n_blocks,),
        in_specs=[
            pl.BlockSpec((4 * g_rows, Kp), lambda i: (i, 0)),
            pl.BlockSpec((Kp, 128), lambda i: (0, 0)),
            pl.BlockSpec((1, 128), lambda i: (0, 0)),
            pl.BlockSpec((g_rows, 128), lambda i: (0, 0)),
            pl.BlockSpec((g_rows, 128), lambda i: (0, 0)),
            pl.BlockSpec((block_n, g_rows), lambda i: (0, 0)),
            pl.BlockSpec((1, 2), lambda i: (0, 0)),
        ],
        out_specs=pl.BlockSpec((1, block_n, 2), lambda i: (i, 0, 0)),
        compiler_params=pltpu.CompilerParams(
            dimension_semantics=("parallel",),
            vmem_limit_bytes=VMEM_LIMIT),
    )(patches, w_bd, shift_t, wt0, wt1, agg, bfc)
    return out.reshape(n_blocks * block_n, 2)


# ----------------------------------------------------------------------------
# Full forward pass
# ----------------------------------------------------------------------------
def cnn_forward(x_nchw, params):
    # NCHW -> NHWC; conv operands in bf16 (MXU native), accumulation in f32.
    x = jnp.transpose(x_nchw, (0, 2, 3, 1)).astype(jnp.bfloat16)
    N, H, W, _ = x.shape
    assert H % 4 == 0 and W % 16 == 0, "need H % 4 == 0 and W % 16 == 0"
    block_n = params["agg"].shape[0]
    assert N % block_n == 0
    n_blocks = N // block_n
    H2, W2 = H // 2, W // 2
    H4, W4 = H // 4, W // 4
    C1 = 128 // P1   # 16

    # ---- layer 1: Conv(3->16,k5,p2) + BN + ReLU + MaxPool(2) ----------------
    p1 = _im2col_packed(x, block_n, P1)                       # (4*N*H2*(W2/8), 600)
    g1 = block_n * H2 * (W2 // P1)
    a1 = conv_bn_relu_pool(p1, params["w1"], params["shift1"],
                           n_blocks=n_blocks, g_rows=g1)      # (N*H2*(W2/8), 128)
    # cols are (pixel, channel): flattening (w_group, pixel, channel) is
    # exactly (wo, channel), so this reshape is a pure reinterpretation.
    a1 = a1.reshape(N, H2, W2, C1)

    # ---- layer 2 + flatten + Dropout(identity) + Linear(F,2) + LogSoftmax ---
    p2 = _im2col_packed(a1, block_n, P2)                      # (4*N*H4*(W4/4), 1600)
    g2 = block_n * H4 * (W4 // P2)
    return conv_pool_fc_logsoftmax(
        p2, params["w2"], params["shift2"], params["wt0"], params["wt1"],
        params["agg"], params["bfc"],
        n_blocks=n_blocks, g_rows=g2, block_n=block_n)


# ----------------------------------------------------------------------------
# Parameter init / prep + pure-JAX reference
# ----------------------------------------------------------------------------
def init_conv_bn(key, cin, cout):
    k1, k2, k3, k4, k5, k6 = jax.random.split(key, 6)
    w = jax.random.normal(k1, (5, 5, cin, cout), jnp.float32) * 0.1   # HWIO
    b = jax.random.normal(k2, (cout,), jnp.float32) * 0.1
    gamma = jax.random.uniform(k3, (cout,), jnp.float32, 0.5, 1.5)
    beta = jax.random.normal(k4, (cout,), jnp.float32) * 0.1
    mean = jax.random.normal(k5, (cout,), jnp.float32) * 0.1
    var = jax.random.uniform(k6, (cout,), jnp.float32, 0.5, 1.5)
    eps = 1e-5
    scale = gamma / jnp.sqrt(var + eps)
    shift = scale * (b - mean) + beta           # conv bias folded into BN shift
    return w, scale, shift


def prepare_params(w1, s1, h1, w2, s2, h2, wfc, bfc, *, H, W, block_n):
    """All weight-side layout work done ONCE here:
      * BN scale folded into the conv weights, then bf16 + block-diagonal
        pixel packing (kron with eye(P)).
      * BN shift tiled across the packed pixels.
      * FC weight permuted from PyTorch NCHW-flatten order to the packed
        pooled layout, tiled per image of a block; 0/1 per-image aggregator.
    """
    C2 = w2.shape[-1]
    H4, W4 = H // 4, W // 4
    n_cls = wfc.shape[1]

    def fold_block_diag(w_hwio, scale, P):
        w2d = (w_hwio * scale).reshape(-1, w_hwio.shape[-1])   # (K*K*Cin, Cout)
        return jnp.kron(jnp.eye(P, dtype=w2d.dtype), w2d).astype(jnp.bfloat16)

    # FC weight: NCHW flatten (c, h, w) -> rows (h, w_group), cols (pixel, c)
    gi = H4 * (W4 // P2)
    wfc_gc = (wfc.reshape(C2, H4, W4, n_cls)
              .transpose(1, 2, 0, 3)                      # (h, w, c, cls)
              .reshape(H4, W4 // P2, P2, C2, n_cls)       # (h, wg, p, c, cls)
              .reshape(gi, P2 * C2, n_cls)).astype(jnp.float32)
    wt = jnp.tile(wfc_gc, (block_n, 1, 1))                # (block_n*gi, 128, cls)
    agg = jnp.kron(jnp.eye(block_n, dtype=jnp.float32),
                   jnp.ones((1, gi), jnp.float32))        # (block_n, block_n*gi)

    return {
        "w1": fold_block_diag(w1, s1, P1),                          # (600, 128) bf16
        "shift1": jnp.tile(h1, (P1,)).reshape(1, -1).astype(jnp.float32),
        "w2": fold_block_diag(w2, s2, P2),                          # (1600, 128) bf16
        "shift2": jnp.tile(h2, (P2,)).reshape(1, -1).astype(jnp.float32),
        "wt0": wt[..., 0],
        "wt1": wt[..., 1],
        "agg": agg,
        "bfc": bfc.reshape(1, -1).astype(jnp.float32),
    }


def ref_forward(x_nchw, raw):
    """Pure-JAX reference.  Conv operands use the same bf16 rounding as the
    MXU kernels (BN scale folded into the weights before the bf16 cast);
    accumulation, shift, pooling, FC and log-softmax are f32."""
    def layer(x, w4, scale, shift):
        wf = (w4 * scale).astype(jnp.bfloat16)
        y = jax.lax.conv_general_dilated(
            x.astype(jnp.bfloat16), wf,
            window_strides=(1, 1), padding=((2, 2), (2, 2)),
            dimension_numbers=("NCHW", "HWIO", "NCHW"),
            preferred_element_type=jnp.float32)
        y = jnp.maximum(y + shift[None, :, None, None], 0.0)
        n, c, h, w = y.shape
        return y.reshape(n, c, h // 2, 2, w // 2, 2).max(axis=(3, 5))

    y = layer(x_nchw.astype(jnp.float32), raw["w1_4d"], raw["scale1"], raw["shift1"])
    y = layer(y, raw["w2_4d"], raw["scale2"], raw["shift2"])
    flat = y.reshape(y.shape[0], -1)                 # PyTorch NCHW flatten order
    logits = jnp.dot(flat, raw["wfc"],
                     precision=jax.lax.Precision.HIGHEST) + raw["bfc"]
    return jax.nn.log_softmax(logits, axis=1)


if __name__ == "__main__":
    key = jax.random.PRNGKey(0)
    kx, k1, k2, k3, k4 = jax.random.split(key, 5)

    # Small shapes consistent with the module (scaled-down 32x32 RGB images;
    # fc in-features follow as 32 * (H/4) * (W/4)).
    N, Cin, H, W = 2, 3, 32, 32
    x = jax.random.normal(kx, (N, Cin, H, W), jnp.float32)

    w1, scale1, shift1 = init_conv_bn(k1, 3, 16)
    w2, scale2, shift2 = init_conv_bn(k2, 16, 32)

    H4, W4, C2 = H // 4, W // 4, 32
    F = C2 * H4 * W4
    wfc = jax.random.normal(k3, (F, 2), jnp.float32) * 0.02
    bfc = jax.random.normal(k4, (2,), jnp.float32) * 0.1

    block_n = _pick_block_n(N, H, W)
    params = prepare_params(w1, scale1, shift1, w2, scale2, shift2, wfc, bfc,
                            H=H, W=W, block_n=block_n)
    raw = {"w1_4d": w1, "scale1": scale1, "shift1": shift1,
           "w2_4d": w2, "scale2": scale2, "shift2": shift2,
           "wfc": wfc, "bfc": bfc}

    out = jax.block_until_ready(jax.jit(cnn_forward)(x, params))
    ref = jax.block_until_ready(ref_forward(x, raw))

    assert out.shape == (N, 2)
    err = float(jnp.max(jnp.abs(out - ref)))
    assert err < 1e-2, f"mismatch vs reference: max|diff|={err:.3e}"

    print("KERNEL_OK")
</pallas_src>

<mosaic_0001>
module attributes {stable_mosaic.version = 11 : i64} {
  func.func @_conv_bn_relu_pool_kernel(%arg0: i32, %arg1: memref<128x600xbf16, #tpu.memory_space<vmem>>, %arg2: memref<600x128xbf16, #tpu.memory_space<vmem>>, %arg3: memref<1x128xf32, #tpu.memory_space<vmem>>, %arg4: memref<32x128xbf16, #tpu.memory_space<vmem>>) attributes {dimension_semantics = [#tpu.dimension_semantics<parallel>], iteration_bounds = array<i64: 2>, scalar_prefetch = 0 : i64, scratch_operands = 0 : i64, tpu.core_type = #tpu.core_type<tc>, window_params = [{transform_indices = @transform_0, window_bounds = array<i64: 128, 600>}, {pipeline_mode = #tpu.pipeline_mode<synchronous>, transform_indices = @transform_1, window_bounds = array<i64: 600, 128>}, {pipeline_mode = #tpu.pipeline_mode<synchronous>, transform_indices = @transform_2, window_bounds = array<i64: 1, 128>}, {transform_indices = @transform_3, window_bounds = array<i64: 32, 128>}]} {
    %c0 = arith.constant 0 : index
    %c0_0 = arith.constant 0 : index
    %0 = vector.load %arg1[%c0, %c0_0] : memref<128x600xbf16, #tpu.memory_space<vmem>>, vector<128x600xbf16>
    %c0_1 = arith.constant 0 : index
    %c0_2 = arith.constant 0 : index
    %1 = vector.load %arg2[%c0_1, %c0_2] : memref<600x128xbf16, #tpu.memory_space<vmem>>, vector<600x128xbf16>
    %cst = arith.constant dense<0.000000e+00> : vector<128x128xf32>
    %2 = tpu.matmul %0, %1, %cst {dimension_numbers = #tpu.dot_dimension_numbers<[1], [0], [0], [1], [0, 0, 1, 1], [], []>} : vector<128x600xbf16>, vector<600x128xbf16>, vector<128x128xf32> -> vector<128x128xf32>
    %3 = vector.extract_strided_slice %2 {offsets = [0, 0], sizes = [32, 128], strides = [1, 1]} : vector<128x128xf32> to vector<32x128xf32>
    %4 = vector.extract_strided_slice %2 {offsets = [32, 0], sizes = [32, 128], strides = [1, 1]} : vector<128x128xf32> to vector<32x128xf32>
    %5 = arith.maximumf %3, %4 : vector<32x128xf32>
    %6 = vector.extract_strided_slice %2 {offsets = [64, 0], sizes = [32, 128], strides = [1, 1]} : vector<128x128xf32> to vector<32x128xf32>
    %7 = vector.extract_strided_slice %2 {offsets = [96, 0], sizes = [32, 128], strides = [1, 1]} : vector<128x128xf32> to vector<32x128xf32>
    %8 = arith.maximumf %6, %7 : vector<32x128xf32>
    %9 = arith.maximumf %5, %8 : vector<32x128xf32>
    %c0_3 = arith.constant 0 : index
    %c0_4 = arith.constant 0 : index
    %10 = vector.load %arg3[%c0_3, %c0_4] : memref<1x128xf32, #tpu.memory_space<vmem>>, vector<1x128xf32>
    %11 = vector.broadcast %10 : vector<1x128xf32> to vector<32x128xf32>
    %12 = arith.addf %9, %11 : vector<32x128xf32>
    %cst_5 = arith.constant 0.000000e+00 : f32
    %13 = vector.broadcast %cst_5 : f32 to vector<32x128xf32>
    %14 = arith.maximumf %12, %13 : vector<32x128xf32>
    %15 = arith.truncf %14 : vector<32x128xf32> to vector<32x128xbf16>
    %c0_6 = arith.constant 0 : index
    %c0_7 = arith.constant 0 : index
    %16 = vector.load %arg4[%c0_6, %c0_7] : memref<32x128xbf16, #tpu.memory_space<vmem>>, vector<32x128xbf16>
    tpu.vector_store %arg4[%c0_6, %c0_7], %15 {strides = array<i32>} : memref<32x128xbf16, #tpu.memory_space<vmem>>, vector<32x128xbf16>,
    return
  }
  func.func @transform_0(%arg0: i32) -> (i32, i32) {
    %c0_i32 = arith.constant 0 : i32
    %c0_i32_0 = arith.constant 0 : i32
    return %arg0, %c0_i32 : i32, i32
  }
  func.func @transform_1(%arg0: i32) -> (i32, i32) {
    %c0_i32 = arith.constant 0 : i32
    %c0_i32_0 = arith.constant 0 : i32
    %c0_i32_1 = arith.constant 0 : i32
    return %c0_i32, %c0_i32_0 : i32, i32
  }
  func.func @transform_2(%arg0: i32) -> (i32, i32) {
    %c0_i32 = arith.constant 0 : i32
    %c0_i32_0 = arith.constant 0 : i32
    %c0_i32_1 = arith.constant 0 : i32
    return %c0_i32, %c0_i32_0 : i32, i32
  }
  func.func @transform_3(%arg0: i32) -> (i32, i32) {
    %c0_i32 = arith.constant 0 : i32
    %c0_i32_0 = arith.constant 0 : i32
    return %arg0, %c0_i32 : i32, i32
  }
}

module attributes {stable_mosaic.version = 11 : i64} {
  func.func @_conv_pool_fc_lsm_kernel(%arg0: i32, %arg1: memref<64x1600xbf16, #tpu.memory_space<vmem>>, %arg2: memref<1600x128xbf16, #tpu.memory_space<vmem>>, %arg3: memref<1x128xf32, #tpu.memory_space<vmem>>, %arg4: memref<16x128xf32, #tpu.memory_space<vmem>>, %arg5: memref<16x128xf32, #tpu.memory_space<vmem>>, %arg6: memref<1x16xf32, #tpu.memory_space<vmem>>, %arg7: memref<1x2xf32, #tpu.memory_space<vmem>>, %arg8: memref<1x1x2xf32, #tpu.memory_space<vmem>>) attributes {dimension_semantics = [#tpu.dimension_semantics<parallel>], iteration_bounds = array<i64: 2>, scalar_prefetch = 0 : i64, scratch_operands = 0 : i64, tpu.core_type = #tpu.core_type<tc>, window_params = [{transform_indices = @transform_0, window_bounds = array<i64: 64, 1600>}, {pipeline_mode = #tpu.pipeline_mode<synchronous>, transform_indices = @transform_1, window_bounds = array<i64: 1600, 128>}, {pipeline_mode = #tpu.pipeline_mode<synchronous>, transform_indices = @transform_2, window_bounds = array<i64: 1, 128>}, {pipeline_mode = #tpu.pipeline_mode<synchronous>, transform_indices = @transform_3, window_bounds = array<i64: 16, 128>}, {pipeline_mode = #tpu.pipeline_mode<synchronous>, transform_indices = @transform_4, window_bounds = array<i64: 16, 128>}, {pipeline_mode = #tpu.pipeline_mode<synchronous>, transform_indices = @transform_5, window_bounds = array<i64: 1, 16>}, {pipeline_mode = #tpu.pipeline_mode<synchronous>, transform_indices = @transform_6, window_bounds = array<i64: 1, 2>}, {transform_indices = @transform_7, window_bounds = array<i64: 1, 1, 2>}]} {
    %c0 = arith.constant 0 : index
    %c0_0 = arith.constant 0 : index
    %0 = vector.load %arg1[%c0, %c0_0] : memref<64x1600xbf16, #tpu.memory_space<vmem>>, vector<64x1600xbf16>
    %c0_1 = arith.constant 0 : index
    %c0_2 = arith.constant 0 : index
    %1 = vector.load %arg2[%c0_1, %c0_2] : memref<1600x128xbf16, #tpu.memory_space<vmem>>, vector<1600x128xbf16>
    %cst = arith.constant dense<0.000000e+00> : vector<64x128xf32>
    %2 = tpu.matmul %0, %1, %cst {dimension_numbers = #tpu.dot_dimension_numbers<[1], [0], [0], [1], [0, 0, 1, 1], [], []>} : vector<64x1600xbf16>, vector<1600x128xbf16>, vector<64x128xf32> -> vector<64x128xf32>
    %3 = vector.extract_strided_slice %2 {offsets = [0, 0], sizes = [16, 128], strides = [1, 1]} : vector<64x128xf32> to vector<16x128xf32>
    %4 = vector.extract_strided_slice %2 {offsets = [16, 0], sizes = [16, 128], strides = [1, 1]} : vector<64x128xf32> to vector<16x128xf32>
    %5 = arith.maximumf %3, %4 : vector<16x128xf32>
    %6 = vector.extract_strided_slice %2 {offsets = [32, 0], sizes = [16, 128], strides = [1, 1]} : vector<64x128xf32> to vector<16x128xf32>
    %7 = vector.extract_strided_slice %2 {offsets = [48, 0], sizes = [16, 128], strides = [1, 1]} : vector<64x128xf32> to vector<16x128xf32>
    %8 = arith.maximumf %6, %7 : vector<16x128xf32>
    %9 = arith.maximumf %5, %8 : vector<16x128xf32>
    %c0_3 = arith.constant 0 : index
    %c0_4 = arith.constant 0 : index
    %10 = vector.load %arg3[%c0_3, %c0_4] : memref<1x128xf32, #tpu.memory_space<vmem>>, vector<1x128xf32>
    %11 = vector.broadcast %10 : vector<1x128xf32> to vector<16x128xf32>
    %12 = arith.addf %9, %11 : vector<16x128xf32>
    %cst_5 = arith.constant 0.000000e+00 : f32
    %13 = vector.broadcast %cst_5 : f32 to vector<16x128xf32>
    %14 = arith.maximumf %12, %13 : vector<16x128xf32>
    %c0_6 = arith.constant 0 : index
    %c0_7 = arith.constant 0 : index
    %15 = vector.load %arg6[%c0_6, %c0_7] : memref<1x16xf32, #tpu.memory_space<vmem>>, vector<1x16xf32>
    %c0_8 = arith.constant 0 : index
    %c0_9 = arith.constant 0 : index
    %16 = vector.load %arg4[%c0_8, %c0_9] : memref<16x128xf32, #tpu.memory_space<vmem>>, vector<16x128xf32>
    %17 = arith.mulf %14, %16 : vector<16x128xf32>
    %cst_10 = arith.constant dense<0.000000e+00> : vector<1x128xf32>
    %18 = tpu.matmul %15, %17, %cst_10 {dimension_numbers = #tpu.dot_dimension_numbers<[1], [0], [0], [1], [0, 0, 1, 1], [], []>} : vector<1x16xf32>, vector<16x128xf32>, vector<1x128xf32> -> vector<1x128xf32>
    %c0_11 = arith.constant 0 : index
    %c0_12 = arith.constant 0 : index
    %19 = vector.load %arg6[%c0_11, %c0_12] : memref<1x16xf32, #tpu.memory_space<vmem>>, vector<1x16xf32>
    %c0_13 = arith.constant 0 : index
    %c0_14 = arith.constant 0 : index
    %20 = vector.load %arg5[%c0_13, %c0_14] : memref<16x128xf32, #tpu.memory_space<vmem>>, vector<16x128xf32>
    %21 = arith.mulf %14, %20 : vector<16x128xf32>
    %cst_15 = arith.constant dense<0.000000e+00> : vector<1x128xf32>
    %22 = tpu.matmul %19, %21, %cst_15 {dimension_numbers = #tpu.dot_dimension_numbers<[1], [0], [0], [1], [0, 0, 1, 1], [], []>} : vector<1x16xf32>, vector<16x128xf32>, vector<1x128xf32> -> vector<1x128xf32>
    %cst_16 = arith.constant dense<0.000000e+00> : vector<1xf32>
    %23 = vector.multi_reduction <add>, %18, %cst_16 [1] : vector<1x128xf32> to vector<1xf32>
    %24 = vector.shape_cast %23 : vector<1xf32> to vector<1x1xf32>
    %c0_17 = arith.constant 0 : index
    %c0_18 = arith.constant 0 : index
    %25 = vector.load %arg7[%c0_17, %c0_18] : memref<1x2xf32, #tpu.memory_space<vmem>>, vector<1x1xf32>
    %26 = arith.addf %24, %25 : vector<1x1xf32>
    %cst_19 = arith.constant dense<0.000000e+00> : vector<1xf32>
    %27 = vector.multi_reduction <add>, %22, %cst_19 [1] : vector<1x128xf32> to vector<1xf32>
    %28 = vector.shape_cast %27 : vector<1xf32> to vector<1x1xf32>
    %c0_20 = arith.constant 0 : index
    %c1 = arith.constant 1 : index
    %29 = vector.load %arg7[%c0_20, %c1] : memref<1x2xf32, #tpu.memory_space<vmem>>, vector<1x1xf32>
    %30 = arith.addf %28, %29 : vector<1x1xf32>
    %31 = arith.maximumf %26, %30 : vector<1x1xf32>
    %32 = arith.subf %26, %31 : vector<1x1xf32>
    %33 = math.exp %32 : vector<1x1xf32>
    %34 = arith.subf %30, %31 : vector<1x1xf32>
    %35 = math.exp %34 : vector<1x1xf32>
    %36 = arith.addf %33, %35 : vector<1x1xf32>
    %37 = math.log %36 : vector<1x1xf32>
    %38 = arith.addf %31, %37 : vector<1x1xf32>
    %39 = arith.subf %26, %38 : vector<1x1xf32>
    %c0_21 = arith.constant 0 : index
    %c0_22 = arith.constant 0 : index
    %c0_23 = arith.constant 0 : index
    %40 = vector.load %arg8[%c0_21, %c0_22, %c0_23] : memref<1x1x2xf32, #tpu.memory_space<vmem>>, vector<1x1x1xf32>
    %41 = vector.shape_cast %40 : vector<1x1x1xf32> to vector<1x1xf32>
    %42 = vector.shape_cast %39 : vector<1x1xf32> to vector<1x1x1xf32>
    tpu.vector_store %arg8[%c0_21, %c0_22, %c0_23], %42 {strides = array<i32>} : memref<1x1x2xf32, #tpu.memory_space<vmem>>, vector<1x1x1xf32>,
    %43 = arith.subf %30, %38 : vector<1x1xf32>
    %c0_24 = arith.constant 0 : index
    %c0_25 = arith.constant 0 : index
    %c1_26 = arith.constant 1 : index
    %44 = vector.load %arg8[%c0_24, %c0_25, %c1_26] : memref<1x1x2xf32, #tpu.memory_space<vmem>>, vector<1x1x1xf32>
    %45 = vector.shape_cast %44 : vector<1x1x1xf32> to vector<1x1xf32>
    %46 = vector.shape_cast %43 : vector<1x1xf32> to vector<1x1x1xf32>
    tpu.vector_store %arg8[%c0_24, %c0_25, %c1_26], %46 {strides = array<i32>} : memref<1x1x2xf32, #tpu.memory_space<vmem>>, vector<1x1x1xf32>,
    return
  }
  func.func @transform_0(%arg0: i32) -> (i32, i32) {
    %c0_i32 = arith.constant 0 : i32
    %c0_i32_0 = arith.constant 0 : i32
    return %arg0, %c0_i32 : i32, i32
  }
  func.func @transform_1(%arg0: i32) -> (i32, i32) {
    %c0_i32 = arith.constant 0 : i32
    %c0_i32_0 = arith.constant 0 : i32
    %c0_i32_1 = arith.constant 0 : i32
    return %c0_i32, %c0_i32_0 : i32, i32
  }
  func.func @transform_2(%arg0: i32) -> (i32, i32) {
    %c0_i32 = arith.constant 0 : i32
    %c0_i32_0 = arith.constant 0 : i32
    %c0_i32_1 = arith.constant 0 : i32
    return %c0_i32, %c0_i32_0 : i32, i32
  }
  func.func @transform_3(%arg0: i32) -> (i32, i32) {
    %c0_i32 = arith.constant 0 : i32
    %c0_i32_0 = arith.constant 0 : i32
    %c0_i32_1 = arith.constant 0 : i32
    return %c0_i32, %c0_i32_0 : i32, i32
  }
  func.func @transform_4(%arg0: i32) -> (i32, i32) {
    %c0_i32 = arith.constant 0 : i32
    %c0_i32_0 = arith.constant 0 : i32
    %c0_i32_1 = arith.constant 0 : i32
    return %c0_i32, %c0_i32_0 : i32, i32
  }
  func.func @transform_5(%arg0: i32) -> (i32, i32) {
    %c0_i32 = arith.constant 0 : i32
    %c0_i32_0 = arith.constant 0 : i32
    %c0_i32_1 = arith.constant 0 : i32
    return %c0_i32, %c0_i32_0 : i32, i32
  }
  func.func @transform_6(%arg0: i32) -> (i32, i32) {
    %c0_i32 = arith.constant 0 : i32
    %c0_i32_0 = arith.constant 0 : i32
    %c0_i32_1 = arith.constant 0 : i32
    return %c0_i32, %c0_i32_0 : i32, i32
  }
  func.func @transform_7(%arg0: i32) -> (i32, i32, i32) {
    %c0_i32 = arith.constant 0 : i32
    %c0_i32_0 = arith.constant 0 : i32
    %c0_i32_1 = arith.constant 0 : i32
    return %arg0, %c0_i32, %c0_i32_0 : i32, i32, i32
  }
}

</mosaic_0001>

<bundles_post_ra>
// kernel: cnn_forward.2
= control target key start
LH: loop header
LB: loop body
LE: loop exit
PB: predicated region body
PF: predicated region fallthrough
CT: control target
= control target key end

     0   :  { %s1581_s12 = smov 0   ;;  %s1794_s0 = inlined_call_operand.vmem [shape: bf16[256,600], index: 0, kind: input, shape index: {}]   ;;  %s1795_s1 = inlined_call_operand.vmem [shape: bf16[600,128], index: 1, kind: input, shape index: {}]   ;;  %s1796_s2 = inlined_call_operand.vmem [shape: f32[1,128], index: 2, kind: input, shape index: {}]   ;;  %s1797_s3 = inlined_call_operand.vmem [shape: bf16[64,128], index: 3, kind: output, shape index: {}]  }
   0x1 LB: > { %s1149_s13 = sadd.s32 4294967295, %s1559_s12   ;;  %p1153_p0 = scmp.ge.s32.totalorder %s1559_s12, 1  ;;  %s1559_s12 = sphi %s1581_s12, %s13_s12  }
   0x2   : > { %p139_p1 = scmp.lt.s32.totalorder %s1559_s12, 3 }
   0x4   : > { %p140_p2 = pnand %p1153_p0, %p139_p1 }
   0x5   : > { %v1459_v0 = vld [vmem:[%s1795_s1 + $0x40] sm:$0xff] (!%p140_p2)   ;;  %v1463_v4 = vld [vmem:[%s1795_s1 + $0x48] sm:$0xff] (!%p140_p2)   ;;  %v1467_v8 = vld [vmem:[%s1795_s1 + $0x50] sm:$0xff] (!%p140_p2)   ;;  %s1154_s19 = sshll.u32 (!%p140_p2), %s1149_s13, 4  ;;  %vm751_vm0 = vcmask (!%p140_p2), 1043456   ;;  %vm726_vm1 = vcmask (!%p140_p2), 719872  }
   0x6   : > { %143 = sbr.rel (%p140_p2) target bundleno = 340 (0x154), region = 32  ;;  %v1460_v1 = vld [vmem:[%s1795_s1 + $0xc0] sm:$0xff] (!%p140_p2)   ;;  %1266 = vmatprep.subr.bf16.mxu0 (!%p140_p2), %v1459_v0  ;;  %v1464_v5 = vld [vmem:[%s1795_s1 + $0xc8] sm:$0xff] (!%p140_p2)   ;;  %v1468_v9 = vld [vmem:[%s1795_s1 + $0xd0] sm:$0xff] (!%p140_p2)   ;;  %p165_p3 = scmp.lt.s32.totalorder (!%p140_p2), %s1154_s19, 31 }
   0x7   : > { %v1461_v2 = vld [vmem:[%s1795_s1] sm:$0xff] (!%p140_p2)   ;;  %1330 = vmatprep.subr.bf16.mxu1 (!%p140_p2), %v1460_v1  ;;  %v1465_v6 = vld [vmem:[%s1795_s1 + $0x8] sm:$0xff] (!%p140_p2)   ;;  %v1469_v10 = vld [vmem:[%s1795_s1 + $0x10] sm:$0xff] (!%p140_p2)   ;;  %s1156_s21 = sshll.u32 (!%p140_p2), %s1149_s13, 2 }
   0x8   : > { %v1462_v3 = vld [vmem:[%s1795_s1 + $0x80] sm:$0xff] (!%p140_p2)   ;;  %1267 = vmatpush3.bf16.msra.mxu0 (!%p140_p2), %v1461_v2  ;;  %v1466_v7 = vld [vmem:[%s1795_s1 + $0x88] sm:$0xff] (!%p140_p2)   ;;  %v1470_v11 = vld [vmem:[%s1795_s1 + $0x90] sm:$0xff] (!%p140_p2)   ;;  %p172_p4 = scmp.lt.s32.totalorder (!%p140_p2), %s1156_s21, 7 }
   0x9   : > { %1331 = vmatpush3.bf16.msra.mxu1 (!%p140_p2), %v1462_v3  ;;  %1268 = vmatprep.subr.bf16.mxu0 (!%p140_p2), %v1463_v4  ;;  %v1471_v12 = vld [vmem:[%s1795_s1 + $0x58] sm:$0xff] (!%p140_p2)   ;;  %v1475_v16 = vld [vmem:[%s1795_s1 + $0x60] sm:$0xff] (!%p140_p2)   ;;  %v1479_v20 = vld [vmem:[%s1795_s1 + $0x68] sm:$0xff] (!%p140_p2)  }
   0xa   : > { %1332 = vmatprep.subr.bf16.mxu1 (!%p140_p2), %v1464_v5  ;;  %v1472_v13 = vld [vmem:[%s1795_s1 + $0xd8] sm:$0xff] (!%p140_p2)   ;;  %v1476_v17 = vld [vmem:[%s1795_s1 + $0xe0] sm:$0xff] (!%p140_p2)   ;;  %v1480_v21 = vld [vmem:[%s1795_s1 + $0xe8] sm:$0xff] (!%p140_p2)  }
   0xb   : > { %v1473_v14 = vld [vmem:[%s1795_s1 + $0x18] sm:$0xff] (!%p140_p2)   ;;  %v1477_v18 = vld [vmem:[%s1795_s1 + $0x20] sm:$0xff] (!%p140_p2)   ;;  %v1481_v22 = vld [vmem:[%s1795_s1 + $0x28] sm:$0xff] (!%p140_p2)  }
   0xc   : > { %1269 = vmatpush3.bf16.msra.mxu0 (!%p140_p2), %v1465_v6  ;;  %v1474_v15 = vld [vmem:[%s1795_s1 + $0x98] sm:$0xff] (!%p140_p2)   ;;  %v1478_v19 = vld [vmem:[%s1795_s1 + $0xa0] sm:$0xff] (!%p140_p2)   ;;  %v1482_v23 = vld [vmem:[%s1795_s1 + $0xa8] sm:$0xff] (!%p140_p2)  }
   0xd   : > { %1333 = vmatpush3.bf16.msra.mxu1 %v1466_v7  ;;  %1270 = vmatprep.subr.bf16.mxu0 %v1467_v8  ;;  %s1799_s19 = smov (!%p165_p3, %s1154_s19), 31  ;;  %v1483_v24 = vld [vmem:[%s1795_s1 + $0x70] sm:$0xff]   ;;  %v1487_v28 = vld [vmem:[%s1795_s1 + $0x78] sm:$0xff]   ;;  %v1497_v36 = vld [vmem:[%s1795_s1 + $0x100] sm:$0xff]   ;;  %s1801_s21 = smov (!%p172_p4, %s1156_s21), 7 }
   0xe   : > { %1334 = vmatprep.subr.bf16.mxu1 %v1468_v9  ;;  %v1484_v25 = vld [vmem:[%s1795_s1 + $0xf0] sm:$0xff]   ;;  %s1450_s17 = smul.u32 20, %s1799_s19  ;;  %v1488_v29 = vld [vmem:[%s1795_s1 + $0xf8] sm:$0xff]   ;;  %v1504_v39 = vld [vmem:[%s1795_s1 + $0x108] sm:$0xff]   ;;  %s1157_s23 = sshll.u32 %s1801_s21, 2 }
   0xf   : > { %v1485_v26 = vld [vmem:[%s1795_s1 + $0x30] sm:$0xff]   ;;  %v1489_v30 = vld [vmem:[%s1795_s1 + $0x38] sm:$0xff]   ;;  %v1531_v50 = vld [vmem:[%s1795_s1 + $0x120] sm:$0xff]   ;;  %s175_s26 = scalar_lea.vmem %s1797_s3, %s1157_s23 }
  0x10   : > { %1271 = vmatpush3.bf16.msra.mxu0 %v1469_v10  ;;  %v1486_v27 = vld [vmem:[%s1795_s1 + $0xb0] sm:$0xff]   ;;  %s1684_s28 = scalar_lea.vmem %s1794_s0, %s1450_s17  ;;  %v1490_v31 = vld [vmem:[%s1795_s1 + $0xb8] sm:$0xff]   ;;  %v1538_v53 = vld [vmem:[%s1795_s1 + $0x128] ss:$0 sps:$4 sm:$0xff]  }
  0x11   : > { %1335 = vmatpush3.bf16.msra.mxu1 %v1470_v11  ;;  %1272 = vmatprep.subr.bf16.mxu0 %v1471_v12  ;;  %v1491_v32 = vld [vmem:[%s1684_s28] ss:$20 sps:$4 sm:$0xff]   ;;  %v1493_v33 = vld [vmem:[%s1684_s28 + $0x4] ss:$20 sps:$4 sm:$0xff]   ;;  %v1494_v34 = vld [vmem:[%s1684_s28 + $0x8] ss:$20 sps:$4 sm:$0xff]  }
  0x12   : > { %1336 = vmatprep.subr.bf16.mxu1 %v1472_v13  ;;  %v1496_v35 = vld [vmem:[%s1684_s28 + $0xc] ss:$20 sps:$4 sm:$0xff]   ;;  %787 = vmatprep.mubr.bf16.mxu0 %v1493_v33  ;;  %v1500_v38 = vld [vmem:[%s1684_s28 + $0x34] ss:$20 sps:$4 sm:$0xff]   ;;  %v1503_v41 = vld [vmem:[%s1684_s28 + $0x30] ss:$20 sps:$4 sm:$0xff]  }
  0x13   : > { %884 = vmatprep.mubr.bf16.mxu1 %v1496_v35  ;;  %v1498_v37 = vld [vmem:[%s1684_s28 + $0x2c] ss:$20 sps:$4 sm:$0xff]   ;;  %v1502_v40 = vld [vmem:[%s1684_s28 + $0x28] ss:$20 sps:$4 sm:$0xff]   ;;  %v1511_v44 = vld [vmem:[%s1795_s1 + $0x110] sm:$0xff]   ;;  %v753_v56 = vsel %vm751_vm0, %v1538_v53, 0 }
  0x14   : > { %1273 = vmatpush3.bf16.msra.mxu0 %v1473_v14  ;;  %v1505_v42 = vld [vmem:[%s1684_s28 + $0x54] ss:$20 sps:$4 sm:$0xff]   ;;  %v1507_v43 = vld [vmem:[%s1684_s28 + $0x5c] ss:$20 sps:$4 sm:$0xff]   ;;  %v1510_v46 = vld [vmem:[%s1684_s28 + $0x58] ss:$20 sps:$4 sm:$0xff]  }
  0x15   : > { %1337 = vmatpush3.bf16.msra.mxu1 %v1474_v15  ;;  %1274 = vmatprep.subr.bf16.mxu0 %v1475_v16  ;;  %v1509_v45 = vld [vmem:[%s1684_s28 + $0x50] ss:$20 sps:$4 sm:$0xff]   ;;  %v1524_v48 = vld [vmem:[%s1795_s1 + $0x118] sm:$0xff]   ;;  %v1517_v52 = vld [vmem:[%s1684_s28 + $0x80] ss:$20 sps:$4 sm:$0xff]  }
  0x16   : > { %1338 = vmatprep.subr.bf16.mxu1 %v1476_v17  ;;  %v1512_v47 = vld [vmem:[%s1684_s28 + $0x7c] ss:$20 sps:$4 sm:$0xff]   ;;  %v1514_v49 = vld [vmem:[%s1684_s28 + $0x84] ss:$20 sps:$4 sm:$0xff]   ;;  %v1520_v55 = vld [vmem:[%s1684_s28 + $0xac] ss:$20 sps:$4 sm:$0xff]  }
  0x17   : > { %v1516_v51 = vld [vmem:[%s1684_s28 + $0x78] ss:$20 sps:$4 sm:$0xff]   ;;  %v1522_v57 = vld [vmem:[%s1684_s28 + $0xa0] ss:$20 sps:$4 sm:$0xff]   ;;  %v1523_v58 = vld [vmem:[%s1684_s28 + $0xa8] ss:$20 sps:$4 sm:$0xff]  }
  0x18   : > { %1275 = vmatpush3.bf16.msra.mxu0 %v1477_v18  ;;  %v1518_v54 = vld [vmem:[%s1684_s28 + $0xa4] ss:$20 sps:$4 sm:$0xff]   ;;  %v1525_v59 = vld [vmem:[%s1684_s28 + $0xcc] ss:$20 sps:$4 sm:$0xff]   ;;  %v1527_v60 = vld [vmem:[%s1684_s28 + $0xd4] ss:$20 sps:$4 sm:$0xff]  }
  0x19   : > { %1339 = vmatpush3.bf16.msra.mxu1 %v1478_v19  ;;  %1276 = vmatprep.subr.bf16.mxu0 %v1479_v20  ;;  %v1529_v61 = vld [vmem:[%s1684_s28 + $0xc8] ss:$20 sps:$4 sm:$0xff]   ;;  %v1530_v62 = vld [vmem:[%s1684_s28 + $0xd0] ss:$20 sps:$4 sm:$0xff]   ;;  %v1537_v2 = vld [vmem:[%s1684_s28 + $0xf8] ss:$20 sps:$4 sm:$0xff]  }
  0x1a   : > { %1340 = vmatprep.subr.bf16.mxu1 %v1480_v21  ;;  %v1532_v63 = vld [vmem:[%s1684_s28 + $0xf4] ss:$20 sps:$4 sm:$0xff]   ;;  %v1534_v0 = vld [vmem:[%s1684_s28 + $0xfc] ss:$20 sps:$4 sm:$0xff]   ;;  %v1541_v4 = vld [vmem:[%s1684_s28 + $0x124] ss:$20 sps:$4 sm:$0xff]  }
  0x1b   : > { %v1536_v1 = vld [vmem:[%s1684_s28 + $0xf0] ss:$20 sps:$4 sm:$0xff]   ;;  %v1543_v5 = vld [vmem:[%s1684_s28 + $0x118] ss:$20 sps:$4 sm:$0xff]   ;;  %v1544_v6 = vld [vmem:[%s1684_s28 + $0x120] ss:$20 sps:$4 sm:$0xff]  }
  0x1c   : > { %1277 = vmatpush3.bf16.msra.mxu0 %v1481_v22  ;;  %v1539_v3 = vld [vmem:[%s1684_s28 + $0x11c] ss:$20 sps:$4 sm:$0xff]   ;;  %v1547_v9 = vld [vmem:[%s1684_s28 + $0x38] ss:$20 sps:$4 sm:$0xff]   ;;  %v1549_v11 = vld [vmem:[%s1684_s28 + $0x60] ss:$20 sps:$4 sm:$0xff]  }
  0x1d   : > { %1341 = vmatpush3.bf16.msra.mxu1 %v1482_v23  ;;  %1278 = vmatprep.subr.bf16.mxu0 %v1483_v24  ;;  %v1545_v7 = vld [vmem:[%s1684_s28 + $0x10] ss:$20 sps:$4 sm:$0xff]   ;;  %v1548_v10 = vld [vmem:[%s1684_s28 + $0xd8] ss:$20 sps:$4 sm:$0xff]   ;;  %v1550_v12 = vld [vmem:[%s1684_s28 + $0x100] ss:$20 sps:$4 sm:$0xff]  }
  0x1e   : > { %1342 = vmatprep.subr.bf16.mxu1 %v1484_v25  ;;  %v1546_v8 = vld [vmem:[%s1684_s28 + $0xb0] ss:$20 sps:$4 sm:$0xff]   ;;  %v1551_v13 = vld [vmem:[%s1684_s28 + $0x88] ss:$20 sps:$4 sm:$0xff]  }
  0x1f   : > { %v1552_v14 = vld [vmem:[%s1684_s28 + $0x128] ss:$20 sps:$4 sm:$0xff]  }
  0x20   : > { %1279 = vmatpush3.bf16.msra.mxu0 %v1485_v26 }
  0x21   : > { %1343 = vmatpush3.bf16.msra.mxu1 %v1486_v27  ;;  %1280 = vmatprep.subr.bf16.mxu0 %v1487_v28 }
  0x22   : > { %1344 = vmatprep.subr.bf16.mxu1 %v1488_v29 }
  0x24   : > { %1281 = vmatpush3.bf16.msra.mxu0 %v1489_v30 }
  0x25   : > { %1345 = vmatpush3.bf16.msra.mxu1 %v1490_v31  ;;  %1408 = vmatprep.subr.bf16.mxu0 %v1497_v36 }
  0x26   : > { %1436 = vmatprep.subr.bf16.mxu1 %v1497_v36 }
  0x27   : > { %788 = vmatmul.mubr.bf16.vlgmr.msra.gmra.mrb[0].mxu0 %v1491_v32 }
  0x28   : > { %885 = vmatmul.mubr.bf16.vlgmr.msra.gmra.mrb[0].mxu1 %v1494_v34  ;;  %1409 = vmatpush3.bf16.msra.mxu0 %v1497_v36 }
  0x29   : > { %1442 = vmatpush3.bf16.msra.mxu1 %v1497_v36  ;;  %795 = vmatprep.mubr.bf16.mxu0 %v1498_v37 }
  0x2a   : > { %892 = vmatprep.mubr.bf16.mxu1 %v1500_v38  ;;  %1410 = vmatprep.subr.bf16.mxu0 %v1504_v39 }
  0x2b   : > { %1437 = vmatprep.subr.bf16.mxu1 %v1504_v39 }
  0x2c   : > { %1411 = vmatpush3.bf16.msra.mxu0 %v1504_v39 }
  0x2d   : > { %1443 = vmatpush3.bf16.msra.mxu1 %v1504_v39  ;;  %1412 = vmatprep.subr.bf16.mxu0 %v1511_v44 }
  0x2e   : > { %1438 = vmatprep.subr.bf16.mxu1 %v1511_v44 }
  0x2f   : > { %796 = vmatmul.mubr.bf16.gmra.mrb[4].mxu0 %v1502_v40 }
  0x30   : > { %893 = vmatmul.mubr.bf16.gmra.mrb[4].mxu1 %v1503_v41  ;;  %803 = vmatprep.mubr.bf16.mxu0 %v1505_v42 }
  0x31   : > { %900 = vmatprep.mubr.bf16.mxu1 %v1507_v43  ;;  %1413 = vmatpush3.bf16.msra.mxu0 %v1511_v44 }
  0x32   : > { %1444 = vmatpush3.bf16.msra.mxu1 %v1511_v44  ;;  %1414 = vmatprep.subr.bf16.mxu0 %v1524_v48 }
  0x33   : > { %1439 = vmatprep.subr.bf16.mxu1 %v1524_v48 }
  0x35   : > { %1415 = vmatpush3.bf16.msra.mxu0 %v1524_v48 }
  0x36   : > { %1445 = vmatpush3.bf16.msra.mxu1 %v1524_v48  ;;  %1416 = vmatprep.subr.bf16.mxu0 %v1531_v50 }
  0x37   : > { %804 = vmatmul.mubr.bf16.gmra.mrb[8].mxu0 %v1509_v45  ;;  %1440 = vmatprep.subr.bf16.mxu1 %v1531_v50 }
  0x38   : > { %901 = vmatmul.mubr.bf16.gmra.mrb[8].mxu1 %v1510_v46  ;;  %811 = vmatprep.mubr.bf16.mxu0 %v1512_v47 }
  0x39   : > { %908 = vmatprep.mubr.bf16.mxu1 %v1514_v49  ;;  %1417 = vmatpush3.bf16.msra.mxu0 %v1531_v50 }
  0x3a   : > { %1446 = vmatpush3.bf16.msra.mxu1 %v1531_v50  ;;  %1448 = vmatprep.subr.msk.bf16.mxu0 %vm751_vm0, %v1538_v53 }
  0x3b   : > { %1449 = vmatprep.subr.msk.bf16.mxu1 %vm751_vm0, %v1538_v53 }
  0x3d   : > { %1419 = vmatpush3.bf16.msra.mxu0 %v753_v56 }
  0x3e   : > { %1447 = vmatpush3.bf16.msra.mxu1 %v753_v56 }
  0x3f   : > { %812 = vmatmul.mubr.bf16.gmra.mrb[12].mxu0 %v1516_v51 }
  0x40   : > { %909 = vmatmul.mubr.bf16.gmra.mrb[12].mxu1 %v1517_v52  ;;  %819 = vmatprep.mubr.bf16.mxu0 %v1518_v54 }
  0x41   : > { %916 = vmatprep.mubr.bf16.mxu1 %v1520_v55 }
  0x47   : > { %820 = vmatmul.mubr.bf16.gmra.mrb[16].mxu0 %v1522_v57 }
  0x48   : > { %917 = vmatmul.mubr.bf16.gmra.mrb[16].mxu1 %v1523_v58  ;;  %827 = vmatprep.mubr.bf16.mxu0 %v1525_v59 }
  0x49   : > { %924 = vmatprep.mubr.bf16.mxu1 %v1527_v60 }
  0x4f   : > { %828 = vmatmul.mubr.bf16.gmra.mrb[20].mxu0 %v1529_v61 }
  0x50   : > { %925 = vmatmul.mubr.bf16.gmra.mrb[20].mxu1 %v1530_v62  ;;  %835 = vmatprep.mubr.bf16.mxu0 %v1532_v63 }
  0x51   : > { %932 = vmatprep.mubr.bf16.mxu1 %v1534_v0 }
  0x57   : > { %836 = vmatmul.mubr.bf16.gmra.mrb[24].mxu0 %v1536_v1 }
  0x58   : > { %933 = vmatmul.mubr.bf16.gmra.mrb[24].mxu1 %v1537_v2  ;;  %843 = vmatprep.mubr.bf16.mxu0 %v1539_v3 }
  0x59   : > { %940 = vmatprep.mubr.bf16.mxu1 %v1541_v4 }
  0x5f   : > { %844 = vmatmul.mubr.bf16.gmra.mrb[28].mxu0 %v1543_v5 }
  0x60   : > { %941 = vmatmul.mubr.bf16.gmra.mrb[28].mxu1 %v1544_v6  ;;  %1420 = vmatprep.mubr.msk.bf16.mxu0 %vm726_vm1, %v1545_v7 }
  0x61   : > { %1428 = vmatprep.mubr.msk.bf16.mxu1 %vm726_vm1, %v1546_v8 }
  0x67   : > { %1421 = vmatmul.mubr.msk.bf16.vlgmr.msra.gmra.mrb[32].mxu0 %vm726_vm1, %v1547_v9 }
  0x68   : > { %1429 = vmatmul.mubr.msk.bf16.vlgmr.msra.gmra.mrb[32].mxu1 %vm726_vm1, %v1548_v10  ;;  %1424 = vmatprep.mubr.msk.bf16.mxu0 %vm726_vm1, %v1549_v11 }
  0x69   : > { %1432 = vmatprep.mubr.msk.bf16.mxu1 %vm726_vm1, %v1550_v12 }
  0x6f   : > { %1425 = vmatmul.mubr.msk.bf16.gmra.mrb[36].mxu0 %vm726_vm1, %v1551_v13 }
  0x70   : > { %1433 = vmatmul.mubr.msk.bf16.gmra.mrb[36].mxu1 %vm726_vm1, %v1552_v14 }
  0xfa   : > { %v1282_v15 = vpop.f32.mrb[0].mxu0 }
  0xfb   : > { %v1346_v16 = vpop.f32.mrb[0].mxu1  ;;  %v1283_v17 = vpop.f32.mrb[1].mxu0 }
  0xfc   : > { %v1284_v18 = vadd.f32 %v1283_v17, %v1282_v15  ;;  %v1347_v19 = vpop.f32.mrb[1].mxu1  ;;  %v1285_v20 = vpop.f32.mrb[2].mxu0 }
  0xfd   : > { %v1348_v21 = vadd.f32 %v1347_v19, %v1346_v16  ;;  %v1349_v22 = vpop.f32.mrb[2].mxu1  ;;  %v1286_v23 = vpop.f32.mrb[3].mxu0 }
  0xfe   : > { %v1287_v24 = vadd.f32 %v1286_v23, %v1285_v20  ;;  %v1350_v25 = vpop.f32.mrb[3].mxu1 }
  0xff   : > { %v1351_v26 = vadd.f32 %v1350_v25, %v1349_v22  ;;  %v1758_v27 = vadd.f32 %v1348_v21, %v1284_v18 }
 0x101   : > { %v1760_v28 = vadd.f32 %v1351_v26, %v1287_v24 }
 0x102   : > { %v1288_v29 = vpop.f32.mrb[4].mxu0 }
 0x103   : > { %v1352_v30 = vpop.f32.mrb[4].mxu1  ;;  %v1289_v31 = vpop.f32.mrb[5].mxu0 }
 0x104   : > { %v1290_v32 = vadd.f32 %v1289_v31, %v1288_v29  ;;  %v1353_v33 = vpop.f32.mrb[5].mxu1  ;;  %v1291_v34 = vpop.f32.mrb[6].mxu0 }
 0x105   : > { %v1354_v35 = vadd.f32 %v1353_v33, %v1352_v30  ;;  %v1355_v36 = vpop.f32.mrb[6].mxu1  ;;  %v1292_v37 = vpop.f32.mrb[7].mxu0 }
 0x106   : > { %v1293_v38 = vadd.f32 %v1292_v37, %v1291_v34  ;;  %v1356_v39 = vpop.f32.mrb[7].mxu1 }
 0x107   : > { %v1357_v40 = vadd.f32 %v1356_v39, %v1355_v36  ;;  %v1762_v41 = vadd.f32 %v1354_v35, %v1290_v32 }
 0x109   : > { %v1764_v42 = vadd.f32 %v1357_v40, %v1293_v38 }
 0x10a   : > { %v1294_v43 = vpop.f32.mrb[8].mxu0 }
 0x10b   : > { %v1358_v44 = vpop.f32.mrb[8].mxu1  ;;  %v1295_v45 = vpop.f32.mrb[9].mxu0 }
 0x10c   : > { %v1296_v46 = vadd.f32 %v1295_v45, %v1294_v43  ;;  %v1359_v47 = vpop.f32.mrb[9].mxu1  ;;  %v1297_v48 = vpop.f32.mrb[10].mxu0 }
 0x10d   : > { %v1360_v49 = vadd.f32 %v1359_v47, %v1358_v44  ;;  %v1361_v50 = vpop.f32.mrb[10].mxu1  ;;  %v1298_v51 = vpop.f32.mrb[11].mxu0 }
 0x10e   : > { %v1299_v52 = vadd.f32 %v1298_v51, %v1297_v48  ;;  %v1362_v53 = vpop.f32.mrb[11].mxu1 }
 0x10f   : > { %v1363_v54 = vadd.f32 %v1362_v53, %v1361_v50  ;;  %v1766_v55 = vadd.f32 %v1360_v49, %v1296_v46 }
 0x111   : > { %v1768_v56 = vadd.f32 %v1363_v54, %v1299_v52 }
 0x112   : > { %v1300_v57 = vpop.f32.mrb[12].mxu0 }
 0x113   : > { %v1364_v58 = vpop.f32.mrb[12].mxu1  ;;  %v1301_v59 = vpop.f32.mrb[13].mxu0 }
 0x114   : > { %v1302_v60 = vadd.f32 %v1301_v59, %v1300_v57  ;;  %v1365_v61 = vpop.f32.mrb[13].mxu1  ;;  %v1303_v62 = vpop.f32.mrb[14].mxu0 }
 0x115   : > { %v1366_v63 = vadd.f32 %v1365_v61, %v1364_v58  ;;  %v1367_v0 = vpop.f32.mrb[14].mxu1  ;;  %v1304_v1 = vpop.f32.mrb[15].mxu0 }
 0x116   : > { %v1305_v2 = vadd.f32 %v1304_v1, %v1303_v62  ;;  %v1368_v3 = vpop.f32.mrb[15].mxu1 }
 0x117   : > { %v1369_v4 = vadd.f32 %v1368_v3, %v1367_v0  ;;  %v1770_v5 = vadd.f32 %v1366_v63, %v1302_v60 }
 0x119   : > { %v1772_v6 = vadd.f32 %v1369_v4, %v1305_v2 }
 0x11a   : > { %v1306_v7 = vpop.f32.mrb[16].mxu0 }
 0x11b   : > { %v1370_v8 = vpop.f32.mrb[16].mxu1  ;;  %v1307_v9 = vpop.f32.mrb[17].mxu0 }
 0x11c   : > { %v1308_v10 = vadd.f32 %v1307_v9, %v1306_v7  ;;  %v1371_v11 = vpop.f32.mrb[17].mxu1  ;;  %v1309_v12 = vpop.f32.mrb[18].mxu0 }
 0x11d   : > { %v1372_v13 = vadd.f32 %v1371_v11, %v1370_v8  ;;  %v1373_v14 = vpop.f32.mrb[18].mxu1  ;;  %v1310_v15 = vpop.f32.mrb[19].mxu0 }
 0x11e   : > { %v1311_v16 = vadd.f32 %v1310_v15, %v1309_v12  ;;  %v1374_v17 = vpop.f32.mrb[19].mxu1 }
 0x11f   : > { %v1375_v18 = vadd.f32 %v1374_v17, %v1373_v14  ;;  %v919_v19 = vadd.f32 %v1372_v13, %v1308_v10 }
 0x121   : > { %v922_v20 = vadd.f32 %v1375_v18, %v1311_v16 }
 0x122   : > { %v1312_v21 = vpop.f32.mrb[20].mxu0 }
 0x123   : > { %v1376_v22 = vpop.f32.mrb[20].mxu1  ;;  %v1313_v23 = vpop.f32.mrb[21].mxu0 }
 0x124   : > { %v1314_v24 = vadd.f32 %v1313_v23, %v1312_v21  ;;  %v1377_v25 = vpop.f32.mrb[21].mxu1  ;;  %v1315_v26 = vpop.f32.mrb[22].mxu0 }
 0x125   : > { %v1378_v29 = vadd.f32 %v1377_v25, %v1376_v22  ;;  %v1379_v30 = vpop.f32.mrb[22].mxu1  ;;  %v1316_v31 = vpop.f32.mrb[23].mxu0 }
 0x126   : > { %v1317_v32 = vadd.f32 %v1316_v31, %v1315_v26  ;;  %v1380_v33 = vpop.f32.mrb[23].mxu1 }
 0x127   : > { %v1381_v34 = vadd.f32 %v1380_v33, %v1379_v30  ;;  %v927_v35 = vadd.f32 %v1378_v29, %v1314_v24 }
 0x129   : > { %v930_v36 = vadd.f32 %v1381_v34, %v1317_v32 }
 0x12a   : > { %v1318_v37 = vpop.f32.mrb[24].mxu0 }
 0x12b   : > { %v1382_v38 = vpop.f32.mrb[24].mxu1  ;;  %v1319_v39 = vpop.f32.mrb[25].mxu0 }
 0x12c   : > { %v1320_v40 = vadd.f32 %v1319_v39, %v1318_v37  ;;  %v1383_v43 = vpop.f32.mrb[25].mxu1  ;;  %v1321_v44 = vpop.f32.mrb[26].mxu0 }
 0x12d   : > { %v1384_v45 = vadd.f32 %v1383_v43, %v1382_v38  ;;  %v1385_v46 = vpop.f32.mrb[26].mxu1  ;;  %v1322_v47 = vpop.f32.mrb[27].mxu0  ;;  %v1244_v38 = vld [vmem:[%s1796_s2] ss:$0 sm:$0xff] }
 0x12e   : > { %v1323_v48 = vadd.f32 %v1322_v47, %v1321_v44  ;;  %v1386_v49 = vpop.f32.mrb[27].mxu1 }
 0x12f   : > { %v1387_v50 = vadd.f32 %v1386_v49, %v1385_v46  ;;  %v935_v51 = vadd.f32 %v1384_v45, %v1320_v40 }
 0x131   : > { %v938_v52 = vadd.f32 %v1387_v50, %v1323_v48 }
 0x132   : > { %v1324_v53 = vpop.f32.mrb[28].mxu0 }
 0x133   : > { %v1388_v54 = vpop.f32.mrb[28].mxu1  ;;  %v1325_v57 = vpop.f32.mrb[29].mxu0 }
 0x134   : > { %v1326_v58 = vadd.f32 %v1325_v57, %v1324_v53  ;;  %v1389_v59 = vpop.f32.mrb[29].mxu1  ;;  %v1327_v60 = vpop.f32.mrb[30].mxu0 }
 0x135   : > { %v1390_v61 = vadd.f32 %v1389_v59, %v1388_v54  ;;  %v1391_v62 = vpop.f32.mrb[30].mxu1  ;;  %v1328_v63 = vpop.f32.mrb[31].mxu0 }
 0x136   : > { %v1329_v0 = vadd.f32 %v1328_v63, %v1327_v60  ;;  %v1392_v1 = vpop.f32.mrb[31].mxu1 }
 0x137   : > { %v1393_v2 = vadd.f32 %v1392_v1, %v1391_v62  ;;  %v943_v3 = vadd.f32 %v1390_v61, %v1326_v58 }
 0x139   : > { %v946_v4 = vadd.f32 %v1393_v2, %v1329_v0 }
 0x13a   : > { %v1422_v7 = vpop.f32.mrb[32].mxu0 }
 0x13b   : > { %v992_v8 = vadd.f32 %v1422_v7, %v1762_v41  ;;  %v1430_v9 = vpop.f32.mrb[32].mxu1  ;;  %v983_v10 = vpop.f32.mrb[33].mxu0 }
 0x13c   : > { %v1024_v11 = vadd.f32 %v1430_v9, %v927_v35  ;;  %v984_v12 = vadd.f32 %v983_v10, %v1758_v27  ;;  %v1015_v13 = vpop.f32.mrb[33].mxu1  ;;  %v1423_v14 = vpop.f32.mrb[34].mxu0 }
 0x13d   : > { %v1016_v15 = vadd.f32 %v1015_v13, %v919_v19  ;;  %v995_v16 = vadd.f32 %v1423_v14, %v1764_v42  ;;  %v1431_v17 = vpop.f32.mrb[34].mxu1  ;;  %v986_v18 = vpop.f32.mrb[35].mxu0 }
 0x13e   : > { %v1027_v21 = vadd.f32 %v1431_v17, %v930_v36  ;;  %v987_v22 = vadd.f32 %v986_v18, %v1760_v28  ;;  %v1018_v23 = vpop.f32.mrb[35].mxu1 }
 0x13f   : > { %v1019_v24 = vadd.f32 %v1018_v23, %v922_v20 }
 0x142   : > { %v1426_v25 = vpop.f32.mrb[36].mxu0 }
 0x143   : > { %v1008_v41 = vadd.f32 %v1426_v25, %v1770_v5  ;;  %v1434_v26 = vpop.f32.mrb[36].mxu1  ;;  %v999_v29 = vpop.f32.mrb[37].mxu0 }
 0x144   : > { %v1040_v27 = vadd.f32 %v1434_v26, %v943_v3  ;;  %v1000_v30 = vadd.f32 %v999_v29, %v1766_v55  ;;  %v1031_v19 = vpop.f32.mrb[37].mxu1  ;;  %v1427_v31 = vpop.f32.mrb[38].mxu0 }
 0x145   : > { %v1048_v42 = vmax.f32 %v992_v8, %v1008_v41  ;;  %v1032_v32 = vadd.f32 %v1031_v19, %v935_v51  ;;  %v1011_v33 = vadd.f32 %v1427_v31, %v1772_v6  ;;  %v1435_v34 = vpop.f32.mrb[38].mxu1  ;;  %v1002_v28 = vpop.f32.mrb[39].mxu0 }
 0x146   : > { %v1052_v20 = vmax.f32 %v1024_v11, %v1040_v27  ;;  %v1046_v35 = vmax.f32 %v984_v12, %v1000_v30  ;;  %v1043_v36 = vadd.f32 %v1435_v34, %v946_v4  ;;  %v1003_v37 = vadd.f32 %v1002_v28, %v1768_v56  ;;  %v1034_v5 = vpop.f32.mrb[39].mxu1 }
 0x147   : > { %v1050_v55 = vmax.f32 %v1016_v15, %v1032_v32  ;;  %v1049_v39 = vmax.f32 %v995_v16, %v1011_v33  ;;  %v1035_v40 = vadd.f32 %v1034_v5, %v938_v52 }
 0x148   : > { %v1056_v43 = vmax.f32 %v1048_v42, %v1052_v20  ;;  %v1053_v44 = vmax.f32 %v1027_v21, %v1043_v36  ;;  %v1047_v45 = vmax.f32 %v987_v22, %v1003_v37 }
 0x149   : > { %v1054_v6 = vmax.f32 %v1046_v35, %v1050_v55  ;;  %v1051_v46 = vmax.f32 %v1019_v24, %v1035_v40 }
 0x14a   : > { %v1067_v47 = vadd.f32 %v1244_v38, %v1056_v43  ;;  %v1057_v48 = vmax.f32 %v1049_v39, %v1053_v44 }
 0x14b   : > { %v1065_v49 = vadd.f32 %v1244_v38, %v1054_v6  ;;  %v1055_v50 = vmax.f32 %v1047_v45, %v1051_v46 }
 0x14c   : > { %v1068_v56 = vadd.f32 %v1244_v38, %v1057_v48  ;;  %v1071_v53 = vmax.f32 %v1067_v47, 0.0 }
 0x14d   : > { %v1066_v51 = vadd.f32 %v1244_v38, %v1055_v50  ;;  %v1069_v57 = vmax.f32 %v1065_v49, 0.0 }
 0x14e   : > { %v1072_v54 = vmax.f32 %v1068_v56, 0.0 }
 0x14f   : > { %v1070_v58 = vmax.f32 %v1066_v51, 0.0 }
 0x150   : > { %v1263_v59 = vpack.c.bf16 %v1072_v54, %v1071_v53 }
 0x151   : > { %v1258_v52 = vpack.c.bf16 %v1070_v58, %v1069_v57 }
 0x152   : > { %1265 = vst [vmem:[%s175_s26 + $0x8] sm:$0xff] %v1263_v59  }
 0x153   : > { %1259 = vst [vmem:[%s175_s26] sm:$0xff] %v1258_v52  }
 0x154 PF: > { %s13_s12 = sadd.s32 1, %s1559_s12  }
 0x155   : > { %p10_p5 = scmp.ge.s32.totalorder %s13_s12, 4  }
 0x157   :  { %12 = sbr.rel (!%p10_p5) target bundleno = 1 (0x1), region = 62 }

// kernel: cnn_forward.3
= control target key start
LH: loop header
LB: loop body
LE: loop exit
PB: predicated region body
PF: predicated region fallthrough
CT: control target
= control target key end

     0   :  { %12 = vsyncpa [#allocation3], 0  ;;  %s3418_s0 = inlined_call_operand.vmem [shape: bf16[128,1600], index: 0, kind: input, shape index: {}]   ;;  %s3419_s1 = inlined_call_operand.vmem [shape: bf16[1600,128], index: 1, kind: input, shape index: {}]   ;;  %s3420_s2 = inlined_call_operand.vmem [shape: f32[1,128], index: 2, kind: input, shape index: {}]   ;;  %s3421_s3 = inlined_call_operand.vmem [shape: f32[16,128], index: 3, kind: input, shape index: {}]   ;;  %s3422_s4 = inlined_call_operand.vmem [shape: f32[16,128], index: 4, kind: input, shape index: {}]   ;;  %s3423_s5 = inlined_call_operand.vmem [shape: f32[1,16], index: 5, kind: input, shape index: {}]   ;;  %s3424_s6 = inlined_call_operand.vmem [shape: f32[1,2], index: 6, kind: input, shape index: {}]   ;;  %s3425_s7 = inlined_call_operand.hbm [shape: f32[2,1,2], index: 7, kind: output, shape index: {}]  }
   0x1   :  { %14 = vsyncpa [#allocation3 + $0x1], 0  ;;  %s2938_s24 = smov 0   ;;  %s2940_s25 = smov 0  }
   0x2   :  { %s2942_s26 = smov 0   ;;  %s2944_s27 = smov 0  }
   0x3 LB: > { %s2959_s28 = sadd.s32 4294967295, %s2890_s27   ;;  %s2143_s29 = sadd.s32 4294967294, %s2890_s27   ;;  %s2890_s27 = sphi %s2944_s27, %s3431_s27   ;;  %s2886_s26 = sphi %s2942_s26, %s3430_s26   ;;  %s2882_s25 = sphi %s2940_s25, %s3429_s25   ;;  %s2878_s24 = sphi %s2938_s24, %s3428_s24  }
   0x4   : > { %s2963_s30 = sadd.s32 1, %s2890_s27   ;;  %s179_s8 = sadd.s32 1, %s2886_s26 }
   0x5   : > { %s176_s9 = ssub.s32 %s2890_s27, %s2963_s30  ;;  %p189_p0 = scmp.ne.s32.totalorder %s2886_s26, %s2882_s25 }
   0x6   : > { %p177_p1 = scmp.eq.s32.totalorder %s176_s9, 0  ;;  %p190_p2 = scmp.eq.s32.totalorder %s2959_s28, 1 }
   0x7   : > { %p195_p3 = scmp.ne.s32.totalorder %s2882_s25, %s2878_s24  ;;  %p196_p4 = scmp.eq.s32.totalorder %s2143_s29, 1 }
   0x8   : > { %s2974_s10 = scalar_select %p177_p1, %s2886_s26, %s179_s8  }
   0x9   : > { %p2976_p5 = por %p190_p2, %p189_p0  ;;  %p2980_p6 = por %p196_p4, %p195_p3 }
   0xa   : > { %p2146_p7 = scmp.ge.s32.totalorder %s2890_s27, 1  ;;  %p242_p8 = scmp.lt.s32.totalorder %s2890_s27, 3 }
   0xc   : > { %p243_p9 = pnand %p2146_p7, %p242_p8 }
   0xd   : > { %v2646_v0 = vld [vmem:[%s3419_s1 + $0x40] sm:$0xff] (!%p243_p9)   ;;  %v2650_v4 = vld [vmem:[%s3419_s1 + $0x48] sm:$0xff] (!%p243_p9)   ;;  %v2654_v8 = vld [vmem:[%s3419_s1 + $0x50] sm:$0xff] (!%p243_p9)   ;;  %s2147_s15 = sshll.u32 (!%p243_p9), %s2959_s28, 3  ;;  %vm1398_vm0 = vcmask (!%p243_p9), 523264   ;;  %vm2893_vm1 = vmmov (!%p243_p9), 0  }
   0xe   : > { %246 = sbr.rel (%p243_p9) target bundleno = 910 (0x38e), region = 48  ;;  %v2647_v1 = vld [vmem:[%s3419_s1 + $0xc0] sm:$0xff] (!%p243_p9)   ;;  %2311 = vmatprep.subr.bf16.mxu0 (!%p243_p9), %v2646_v0  ;;  %v2651_v5 = vld [vmem:[%s3419_s1 + $0xc8] sm:$0xff] (!%p243_p9)   ;;  %v2655_v9 = vld [vmem:[%s3419_s1 + $0xd0] sm:$0xff] (!%p243_p9)   ;;  %p275_p10 = scmp.lt.s32.totalorder (!%p243_p9), %s2147_s15, 15  ;;  %vm1888_vm2 = vcmask (!%p243_p9), 130048  }
   0xf   : > { %v2648_v2 = vld [vmem:[%s3419_s1] sm:$0xff] (!%p243_p9)   ;;  %2351 = vmatprep.subr.bf16.mxu1 (!%p243_p9), %v2647_v1  ;;  %v2652_v6 = vld [vmem:[%s3419_s1 + $0x8] sm:$0xff] (!%p243_p9)   ;;  %v2656_v10 = vld [vmem:[%s3419_s1 + $0x10] sm:$0xff] (!%p243_p9)   ;;  %vm2036_vm3 = vcmask (!%p243_p9), 1040384   ;;  %s272_s20 = sand.u32 (!%p243_p9), 1, %s2882_s25   ;;  %vm2066_vm4 = vcmask (!%p243_p9), 0  }
  0x10   : > { %v2649_v3 = vld [vmem:[%s3419_s1 + $0x80] sm:$0xff] (!%p243_p9)   ;;  %2312 = vmatpush3.bf16.msra.mxu0 (!%p243_p9), %v2648_v2  ;;  %v2653_v7 = vld [vmem:[%s3419_s1 + $0x88] sm:$0xff] (!%p243_p9)   ;;  %v2657_v11 = vld [vmem:[%s3419_s1 + $0x90] sm:$0xff] (!%p243_p9)   ;;  %s273_s21 = scalar_lea.vmem (!%p243_p9), [#allocation2], %s272_s20  ;;  %s2308_s23 = sshll.u32 (!%p243_p9), %s2959_s28, 4  ;;  %vm2073_vm5 = vcmask (!%p243_p9), 8200  }
  0x11   : > { %2352 = vmatpush3.bf16.msra.mxu1 (!%p243_p9), %v2649_v3  ;;  %2313 = vmatprep.subr.bf16.mxu0 (!%p243_p9), %v2650_v4  ;;  %v2658_v12 = vld [vmem:[%s3419_s1 + $0x58] sm:$0xff] (!%p243_p9)   ;;  %v2662_v16 = vld [vmem:[%s3419_s1 + $0x60] sm:$0xff] (!%p243_p9)   ;;  %v2666_v20 = vld [vmem:[%s3419_s1 + $0x68] sm:$0xff] (!%p243_p9)   ;;  %s2088_s29 = sshll.u32 (!%p243_p9), %s273_s21, 4  ;;  %s2076_s14 = scalar_lea.sflag (!%p243_p9), [#allocation3], %s272_s20  ;;  %s3378_s29 = int_to_ptr.vmem [resolvable:$true] %s2088_s29 }
  0x12   : > { %2353 = vmatprep.subr.bf16.mxu1 (!%p243_p9), %v2651_v5  ;;  %v2659_v13 = vld [vmem:[%s3419_s1 + $0xd8] sm:$0xff] (!%p243_p9)   ;;  %v2663_v17 = vld [vmem:[%s3419_s1 + $0xe0] sm:$0xff] (!%p243_p9)   ;;  %v2667_v21 = vld [vmem:[%s3419_s1 + $0xe8] sm:$0xff] (!%p243_p9)   ;;  %s2828_s16 = scalar_lea.vmem (!%p243_p9), %s3378_s29, 16  ;;  %s2897_s28 = smov (!%p243_p9), [#allocation2]  }
  0x13   : > { %v2660_v14 = vld [vmem:[%s3419_s1 + $0x18] sm:$0xff] (!%p243_p9)   ;;  %v2664_v18 = vld [vmem:[%s3419_s1 + $0x20] sm:$0xff] (!%p243_p9)   ;;  %v2668_v22 = vld [vmem:[%s3419_s1 + $0x28] sm:$0xff] (!%p243_p9)   ;;  %p2829_p11 = scmp.ne.s32.totalorder (!%p243_p9), %s3378_s29, %s2828_s16  ;;  %s2832_s17 = sshll.u32 (!%p243_p9), %s2897_s28, 4  ;;  %s2833_s17 = int_to_ptr.vmem [resolvable:$false] %s2832_s17 }
  0x14   : > { %2314 = vmatpush3.bf16.msra.mxu0 (!%p243_p9), %v2652_v6  ;;  %v2661_v15 = vld [vmem:[%s3419_s1 + $0x98] sm:$0xff] (!%p243_p9)   ;;  %v2665_v19 = vld [vmem:[%s3419_s1 + $0xa0] sm:$0xff] (!%p243_p9)   ;;  %v2669_v23 = vld [vmem:[%s3419_s1 + $0xa8] sm:$0xff] (!%p243_p9)   ;;  %s2834_s18 = scalar_lea.vmem (!%p243_p9), %s2833_s17, 32  ;;  %p2835_p0 = scmp.lt.s32.totalorder (!%p243_p9), %s3378_s29, %s2833_s17 }
  0x15   : > { %2354 = vmatpush3.bf16.msra.mxu1 %v2653_v7  ;;  %2315 = vmatprep.subr.bf16.mxu0 %v2654_v8  ;;  %s3433_s15 = smov (!%p275_p10, %s2147_s15), 15  ;;  %v2670_v24 = vld [vmem:[%s3419_s1 + $0x70] sm:$0xff]   ;;  %v2674_v28 = vld [vmem:[%s3419_s1 + $0x78] sm:$0xff]   ;;  %v2684_v36 = vld [vmem:[%s3419_s1 + $0x140] sm:$0xff]   ;;  %p2830_p12 = pnand %p2829_p11, %p2976_p5 }
  0x16   : > { %2355 = vmatprep.subr.bf16.mxu1 %v2655_v9  ;;  %v2671_v25 = vld [vmem:[%s3419_s1 + $0xf0] sm:$0xff]   ;;  %s2601_s8 = smul.u32 52, %s3433_s15  ;;  %v2675_v29 = vld [vmem:[%s3419_s1 + $0xf8] sm:$0xff]   ;;  %v2685_v37 = vld [vmem:[%s3419_s1 + $0x100] sm:$0xff]   ;;  %s2896_s15 = smov 1  }
  0x17   : > { %v2672_v26 = vld [vmem:[%s3419_s1 + $0x30] sm:$0xff]   ;;  %v2676_v30 = vld [vmem:[%s3419_s1 + $0x38] sm:$0xff]   ;;  %v2686_v38 = vld [vmem:[%s3419_s1 + $0x1c0] sm:$0xff]   ;;  %p2831_p13 = pneg %p2830_p12  ;;  %p2836_p1 = scmp.lt.s32.totalorder %s2834_s18, %s2828_s16 }
  0x18   : > { %2316 = vmatpush3.bf16.msra.mxu0 %v2656_v10  ;;  %v2673_v27 = vld [vmem:[%s3419_s1 + $0xb0] sm:$0xff]   ;;  %s3080_s22 = scalar_lea.vmem %s3418_s0, %s2601_s8  ;;  %v2677_v31 = vld [vmem:[%s3419_s1 + $0xb8] sm:$0xff]   ;;  %v2687_v39 = vld [vmem:[%s3419_s1 + $0x180] sm:$0xff]   ;;  %s3376_s8 = scalar_lea.hbm %s3425_s7, %s2308_s23 }
  0x19   : > { %2356 = vmatpush3.bf16.msra.mxu1 %v2657_v11  ;;  %2317 = vmatprep.subr.bf16.mxu0 %v2658_v12  ;;  %v2678_v32 = vld [vmem:[%s3080_s22] ss:$52 sps:$4 sm:$0xff]   ;;  %v2680_v33 = vld [vmem:[%s3080_s22 + $0x4] ss:$52 sps:$4 sm:$0xff]   ;;  %v2681_v34 = vld [vmem:[%s3080_s22 + $0x8] ss:$52 sps:$4 sm:$0xff]   ;;  %p2837_p2 = por %p2836_p1, %p2835_p0 }
  0x1a   : > { %2357 = vmatprep.subr.bf16.mxu1 %v2659_v13  ;;  %v2683_v35 = vld [vmem:[%s3080_s22 + $0xc] ss:$52 sps:$4 sm:$0xff]   ;;  %1443 = vmatprep.mubr.bf16.mxu0 %v2680_v33  ;;  %v2693_v44 = vld [vmem:[%s3080_s22 + $0x74] ss:$52 sps:$4 sm:$0xff]   ;;  %v2697_v47 = vld [vmem:[%s3080_s22 + $0x70] ss:$52 sps:$4 sm:$0xff]  }
  0x1b   : > { %1508 = vmatprep.mubr.bf16.mxu1 %v2683_v35  ;;  %v2688_v40 = vld [vmem:[%s3419_s1 + $0x148] sm:$0xff]   ;;  %v2698_v48 = vld [vmem:[%s3419_s1 + $0x150] sm:$0xff]   ;;  %v2702_v52 = vld [vmem:[%s3419_s1 + $0x158] sm:$0xff]   ;;  %p2838_p3 = pnand %p2837_p2, %p2831_p13 }
  0x1c   : > { %2318 = vmatpush3.bf16.msra.mxu0 %v2660_v14  ;;  %v2689_v41 = vld [vmem:[%s3419_s1 + $0x108] sm:$0xff]   ;;  %v2699_v49 = vld [vmem:[%s3419_s1 + $0x110] sm:$0xff]   ;;  %v2703_v53 = vld [vmem:[%s3419_s1 + $0x118] sm:$0xff]  }
  0x1d   : > { %2358 = vmatpush3.bf16.msra.mxu1 %v2661_v15  ;;  %2319 = vmatprep.subr.bf16.mxu0 %v2662_v16  ;;  %v2690_v42 = vld [vmem:[%s3419_s1 + $0x1c8] sm:$0xff]   ;;  %v2700_v50 = vld [vmem:[%s3419_s1 + $0x1d0] sm:$0xff]   ;;  %v2704_v54 = vld [vmem:[%s3419_s1 + $0x1d8] sm:$0xff]  }
  0x1e   : > { %2359 = vmatprep.subr.bf16.mxu1 %v2663_v17  ;;  %v2691_v43 = vld [vmem:[%s3080_s22 + $0x6c] ss:$52 sps:$4 sm:$0xff]   ;;  %v2696_v46 = vld [vmem:[%s3080_s22 + $0x68] ss:$52 sps:$4 sm:$0xff]   ;;  %v2701_v51 = vld [vmem:[%s3419_s1 + $0x190] sm:$0xff]  }
  0x1f   : > { %v2695_v45 = vld [vmem:[%s3419_s1 + $0x188] sm:$0xff]   ;;  %v2707_v56 = vld [vmem:[%s3080_s22 + $0xdc] ss:$52 sps:$4 sm:$0xff]   ;;  %v2712_v60 = vld [vmem:[%s3419_s1 + $0x160] sm:$0xff]  }
  0x20   : > { %2320 = vmatpush3.bf16.msra.mxu0 %v2664_v18  ;;  %v2705_v55 = vld [vmem:[%s3080_s22 + $0xd4] ss:$52 sps:$4 sm:$0xff]   ;;  %v2709_v57 = vld [vmem:[%s3419_s1 + $0x198] sm:$0xff]   ;;  %v2710_v58 = vld [vmem:[%s3080_s22 + $0xd0] ss:$52 sps:$4 sm:$0xff]  }
  0x21   : > { %2360 = vmatpush3.bf16.msra.mxu1 %v2665_v19  ;;  %2321 = vmatprep.subr.bf16.mxu0 %v2666_v20  ;;  %v2711_v59 = vld [vmem:[%s3080_s22 + $0xd8] ss:$52 sps:$4 sm:$0xff]   ;;  %v2713_v61 = vld [vmem:[%s3419_s1 + $0x120] sm:$0xff]   ;;  %v2719_v3 = vld [vmem:[%s3080_s22 + $0x13c] ss:$52 sps:$4 sm:$0xff]  }
  0x22   : > { %2361 = vmatprep.subr.bf16.mxu1 %v2667_v21  ;;  %v2714_v62 = vld [vmem:[%s3419_s1 + $0x1e0] sm:$0xff]   ;;  %v2716_v0 = vld [vmem:[%s3419_s1 + $0x168] sm:$0xff]   ;;  %v2726_v8 = vld [vmem:[%s3419_s1 + $0x170] sm:$0xff]  }
  0x23   : > { %v2715_v63 = vld [vmem:[%s3419_s1 + $0x1a0] sm:$0xff]   ;;  %v2717_v1 = vld [vmem:[%s3419_s1 + $0x128] sm:$0xff]   ;;  %v2727_v9 = vld [vmem:[%s3419_s1 + $0x130] sm:$0xff]  }
  0x24   : > { %2322 = vmatpush3.bf16.msra.mxu0 %v2668_v22  ;;  %v2718_v2 = vld [vmem:[%s3419_s1 + $0x1e8] sm:$0xff]   ;;  %v2721_v4 = vld [vmem:[%s3080_s22 + $0x144] ss:$52 sps:$4 sm:$0xff]   ;;  %v2725_v7 = vld [vmem:[%s3080_s22 + $0x140] ss:$52 sps:$4 sm:$0xff]  }
  0x25   : > { %2362 = vmatpush3.bf16.msra.mxu1 %v2669_v23  ;;  %2323 = vmatprep.subr.bf16.mxu0 %v2670_v24  ;;  %v2723_v5 = vld [vmem:[%s3419_s1 + $0x1a8] sm:$0xff]   ;;  %v2728_v10 = vld [vmem:[%s3419_s1 + $0x1f0] sm:$0xff]   ;;  %v2730_v12 = vld [vmem:[%s3419_s1 + $0x178] sm:$0xff]  }
  0x26   : > { %2363 = vmatprep.subr.bf16.mxu1 %v2671_v25  ;;  %v2724_v6 = vld [vmem:[%s3080_s22 + $0x138] ss:$52 sps:$4 sm:$0xff]   ;;  %v2729_v11 = vld [vmem:[%s3419_s1 + $0x1b0] sm:$0xff]   ;;  %v2737_v18 = vld [vmem:[%s3419_s1 + $0x240] sm:$0xff]  }
  0x27   : > { %v2731_v13 = vld [vmem:[%s3419_s1 + $0x138] sm:$0xff]   ;;  %v2733_v15 = vld [vmem:[%s3080_s22 + $0x10] ss:$52 sps:$4 sm:$0xff]   ;;  %v2735_v16 = vld [vmem:[%s3080_s22 + $0x14] ss:$52 sps:$4 sm:$0xff]  }
  0x28   : > { %2324 = vmatpush3.bf16.msra.mxu0 %v2672_v26  ;;  %v2732_v14 = vld [vmem:[%s3419_s1 + $0x1f8] sm:$0xff]   ;;  %v2741_v21 = vld [vmem:[%s3419_s1 + $0x200] sm:$0xff]   ;;  %v2744_v24 = vld [vmem:[%s3419_s1 + $0x248] sm:$0xff]  }
  0x29   : > { %2364 = vmatpush3.bf16.msra.mxu1 %v2673_v27  ;;  %2325 = vmatprep.subr.bf16.mxu0 %v2674_v28  ;;  %v2736_v17 = vld [vmem:[%s3419_s1 + $0x1b8] sm:$0xff]   ;;  %v2742_v22 = vld [vmem:[%s3419_s1 + $0x2c0] sm:$0xff]   ;;  %v2745_v25 = vld [vmem:[%s3419_s1 + $0x208] sm:$0xff]  }
  0x2a   : > { %2365 = vmatprep.subr.bf16.mxu1 %v2675_v29  ;;  %v2738_v19 = vld [vmem:[%s3080_s22 + $0x18] ss:$52 sps:$4 sm:$0xff]   ;;  %v2740_v20 = vld [vmem:[%s3080_s22 + $0x1c] ss:$52 sps:$4 sm:$0xff]   ;;  %v2743_v23 = vld [vmem:[%s3419_s1 + $0x280] sm:$0xff]  }
  0x2b   : > { %v2746_v26 = vld [vmem:[%s3419_s1 + $0x2c8] sm:$0xff]   ;;  %v2747_v27 = vld [vmem:[%s3080_s22 + $0x7c] ss:$52 sps:$4 sm:$0xff]   ;;  %v2755_v33 = vld [vmem:[%s3080_s22 + $0x80] ss:$52 sps:$4 sm:$0xff]  }
  0x2c   : > { %2326 = vmatpush3.bf16.msra.mxu0 %v2676_v30  ;;  %v2749_v28 = vld [vmem:[%s3419_s1 + $0x288] sm:$0xff]   ;;  %v2751_v30 = vld [vmem:[%s3419_s1 + $0x250] sm:$0xff]  }
  0x2d   : > { %2366 = vmatpush3.bf16.msra.mxu1 %v2677_v31  ;;  %2391 = vmatprep.subr.bf16.mxu0 %v2684_v36  ;;  %v2750_v29 = vld [vmem:[%s3080_s22 + $0x78] ss:$52 sps:$4 sm:$0xff]   ;;  %v2757_v35 = vld [vmem:[%s3419_s1 + $0x290] sm:$0xff]  }
  0x2e   : > { %2431 = vmatprep.subr.bf16.mxu1 %v2686_v38  ;;  %v2752_v31 = vld [vmem:[%s3080_s22 + $0x84] ss:$52 sps:$4 sm:$0xff]  }
  0x2f   : > { %1444 = vmatmul.mubr.bf16.vlgmr.msra.gmra.mrb[0].mxu0 %v2678_v32  ;;  %v2754_v32 = vld [vmem:[%s3419_s1 + $0x210] sm:$0xff]   ;;  %v2758_v36 = vld [vmem:[%s3419_s1 + $0x258] sm:$0xff]  }
  0x30   : > { %1509 = vmatmul.mubr.bf16.vlgmr.msra.gmra.mrb[0].mxu1 %v2681_v34  ;;  %2392 = vmatpush3.bf16.msra.mxu0 %v2685_v37  ;;  %v2756_v34 = vld [vmem:[%s3419_s1 + $0x2d0] sm:$0xff]   ;;  %v2759_v37 = vld [vmem:[%s3419_s1 + $0x218] sm:$0xff]  }
  0x31   : > { %2432 = vmatpush3.bf16.msra.mxu1 %v2687_v39  ;;  %2393 = vmatprep.subr.bf16.mxu0 %v2688_v40  ;;  %v2760_v38 = vld [vmem:[%s3419_s1 + $0x2d8] sm:$0xff]  }
  0x32   : > { %2433 = vmatprep.subr.bf16.mxu1 %v2690_v42  ;;  %1451 = vmatprep.mubr.bf16.mxu0 %v2691_v43  ;;  %v2761_v39 = vld [vmem:[%s3080_s22 + $0xe4] ss:$52 sps:$4 sm:$0xff]   ;;  %v2766_v43 = vld [vmem:[%s3080_s22 + $0xec] ss:$52 sps:$4 sm:$0xff]  }
  0x33   : > { %1516 = vmatprep.mubr.bf16.mxu1 %v2693_v44  ;;  %v2763_v40 = vld [vmem:[%s3419_s1 + $0x298] sm:$0xff]   ;;  %v2765_v42 = vld [vmem:[%s3419_s1 + $0x260] sm:$0xff]  }
  0x34   : > { %2394 = vmatpush3.bf16.msra.mxu0 %v2689_v41  ;;  %v2764_v41 = vld [vmem:[%s3080_s22 + $0xe0] ss:$52 sps:$4 sm:$0xff]  }
  0x35   : > { %2434 = vmatpush3.bf16.msra.mxu1 %v2695_v45  ;;  %2395 = vmatprep.subr.bf16.mxu0 %v2698_v48  ;;  %v2768_v44 = vld [vmem:[%s3419_s1 + $0x220] sm:$0xff]   ;;  %v2769_v45 = vld [vmem:[%s3080_s22 + $0xe8] ss:$52 sps:$4 sm:$0xff]  }
  0x36   : > { %2435 = vmatprep.subr.bf16.mxu1 %v2700_v50  ;;  %v2772_v48 = vld [vmem:[%s3419_s1 + $0x268] sm:$0xff]  }
  0x37   : > { %1452 = vmatmul.mubr.bf16.gmra.mrb[4].mxu0 %v2696_v46  ;;  %v2770_v46 = vld [vmem:[%s3419_s1 + $0x2e0] sm:$0xff]   ;;  %v2774_v50 = vld [vmem:[%s3419_s1 + $0x2e8] sm:$0xff]  }
  0x38   : > { %1517 = vmatmul.mubr.bf16.gmra.mrb[4].mxu1 %v2697_v47  ;;  %2396 = vmatpush3.bf16.msra.mxu0 %v2699_v49  ;;  %v2771_v47 = vld [vmem:[%s3419_s1 + $0x2a0] sm:$0xff]   ;;  %v2773_v49 = vld [vmem:[%s3419_s1 + $0x228] sm:$0xff]  }
  0x39   : > { %2436 = vmatpush3.bf16.msra.mxu1 %v2701_v51  ;;  %2397 = vmatprep.subr.bf16.mxu0 %v2702_v52  ;;  %v2775_v51 = vld [vmem:[%s3080_s22 + $0x14c] ss:$52 sps:$4 sm:$0xff]  }
  0x3a   : > { %2437 = vmatprep.subr.bf16.mxu1 %v2704_v54  ;;  %1459 = vmatprep.mubr.bf16.mxu0 %v2705_v55  ;;  %v2777_v52 = vld [vmem:[%s3419_s1 + $0x2a8] sm:$0xff]   ;;  %v2779_v54 = vld [vmem:[%s3419_s1 + $0x270] sm:$0xff]  }
  0x3b   : > { %1524 = vmatprep.mubr.bf16.mxu1 %v2707_v56  ;;  %v2780_v55 = vld [vmem:[%s3080_s22 + $0x154] ss:$52 sps:$4 sm:$0xff]  }
  0x3c   : > { %2398 = vmatpush3.bf16.msra.mxu0 %v2703_v53  ;;  %v2778_v53 = vld [vmem:[%s3080_s22 + $0x148] ss:$52 sps:$4 sm:$0xff]   ;;  %v2782_v56 = vld [vmem:[%s3419_s1 + $0x230] sm:$0xff]  }
  0x3d   : > { %2438 = vmatpush3.bf16.msra.mxu1 %v2709_v57  ;;  %2399 = vmatprep.subr.bf16.mxu0 %v2712_v60  ;;  %v2783_v57 = vld [vmem:[%s3080_s22 + $0x150] ss:$52 sps:$4 sm:$0xff]   ;;  %v2786_v60 = vld [vmem:[%s3419_s1 + $0x278] sm:$0xff]  }
  0x3e   : > { %2439 = vmatprep.subr.bf16.mxu1 %v2714_v62  ;;  %v2788_v62 = vld [vmem:[%s3419_s1 + $0x2f8] sm:$0xff]  }
  0x3f   : > { %1460 = vmatmul.mubr.bf16.gmra.mrb[8].mxu0 %v2710_v58  ;;  %v2784_v58 = vld [vmem:[%s3419_s1 + $0x2f0] sm:$0xff]  }
  0x40   : > { %1525 = vmatmul.mubr.bf16.gmra.mrb[8].mxu1 %v2711_v59  ;;  %2400 = vmatpush3.bf16.msra.mxu0 %v2713_v61  ;;  %v2785_v59 = vld [vmem:[%s3419_s1 + $0x2b0] sm:$0xff]   ;;  %v2787_v61 = vld [vmem:[%s3419_s1 + $0x238] sm:$0xff]  }
  0x41   : > { %2440 = vmatpush3.bf16.msra.mxu1 %v2715_v63  ;;  %2401 = vmatprep.subr.bf16.mxu0 %v2716_v0  ;;  %v2789_v63 = vld [vmem:[%s3080_s22 + $0x20] ss:$52 sps:$4 sm:$0xff]   ;;  %v2791_v0 = vld [vmem:[%s3080_s22 + $0x24] ss:$52 sps:$4 sm:$0xff]  }
  0x42   : > { %2441 = vmatprep.subr.bf16.mxu1 %v2718_v2  ;;  %1467 = vmatprep.mubr.bf16.mxu0 %v2719_v3  ;;  %v2793_v2 = vld [vmem:[%s3080_s22 + $0x28] ss:$52 sps:$4 sm:$0xff]   ;;  %v2795_v3 = vld [vmem:[%s3080_s22 + $0x2c] ss:$52 sps:$4 sm:$0xff]  }
  0x43   : > { %1532 = vmatprep.mubr.bf16.mxu1 %v2721_v4  ;;  %v2796_v4 = vld [vmem:[%s3080_s22 + $0x8c] ss:$52 sps:$4 sm:$0xff]  }
  0x44   : > { %2402 = vmatpush3.bf16.msra.mxu0 %v2717_v1  ;;  %v2792_v1 = vld [vmem:[%s3419_s1 + $0x2b8] sm:$0xff]  }
  0x45   : > { %2442 = vmatpush3.bf16.msra.mxu1 %v2723_v5  ;;  %2403 = vmatprep.subr.bf16.mxu0 %v2726_v8  ;;  %v2799_v5 = vld [vmem:[%s3080_s22 + $0x94] ss:$52 sps:$4 sm:$0xff]  }
  0x46   : > { %2443 = vmatprep.subr.bf16.mxu1 %v2728_v10  ;;  %v2802_v8 = vld [vmem:[%s3080_s22 + $0xf4] ss:$52 sps:$4 sm:$0xff]  }
  0x47   : > { %1468 = vmatmul.mubr.bf16.gmra.mrb[12].mxu0 %v2724_v6  ;;  %v2798_v6 = vld [vmem:[%s3080_s22 + $0x88] ss:$52 sps:$4 sm:$0xff]  }
  0x48   : > { %1533 = vmatmul.mubr.bf16.gmra.mrb[12].mxu1 %v2725_v7  ;;  %2404 = vmatpush3.bf16.msra.mxu0 %v2727_v9  ;;  %v2805_v7 = vld [vmem:[%s3419_s1 + $0x300] sm:$0xff]   ;;  %v2809_v10 = vld [vmem:[%s3419_s1 + $0x308] sm:$0xff]  }
  0x49   : > { %2444 = vmatpush3.bf16.msra.mxu1 %v2729_v11  ;;  %2405 = vmatprep.subr.bf16.mxu0 %v2730_v12  ;;  %v2801_v9 = vld [vmem:[%s3080_s22 + $0x90] ss:$52 sps:$4 sm:$0xff]  }
  0x4a   : > { %2445 = vmatprep.subr.bf16.mxu1 %v2732_v14  ;;  %1573 = vmatprep.mubr.bf16.mxu0 %v2735_v16  ;;  %v2806_v11 = vld [vmem:[%s3080_s22 + $0xfc] ss:$52 sps:$4 sm:$0xff]   ;;  %v2808_v16 = vld [vmem:[%s3080_s22 + $0xf8] ss:$52 sps:$4 sm:$0xff]  }
  0x4b   : > { %1638 = vmatprep.mubr.bf16.mxu1 %v2740_v20  ;;  %v2813_v12 = vld [vmem:[%s3419_s1 + $0x310] sm:$0xff]   ;;  %v2817_v14 = vld [vmem:[%s3419_s1 + $0x318] sm:$0xff]  }
  0x4c   : > { %2406 = vmatpush3.bf16.msra.mxu0 %v2731_v13  ;;  %v2804_v13 = vld [vmem:[%s3080_s22 + $0xf0] ss:$52 sps:$4 sm:$0xff]   ;;  %v2816_v20 = vld [vmem:[%s3080_s22 + $0x160] ss:$52 sps:$4 sm:$0xff]  }
  0x4d   : > { %2446 = vmatpush3.bf16.msra.mxu1 %v2736_v17  ;;  %2471 = vmatprep.subr.bf16.mxu0 %v2737_v18  ;;  %v2814_v17 = vld [vmem:[%s3080_s22 + $0x164] ss:$52 sps:$4 sm:$0xff]  }
  0x4e   : > { %2511 = vmatprep.subr.bf16.mxu1 %v2742_v22  ;;  %v2812_v18 = vld [vmem:[%s3080_s22 + $0x158] ss:$52 sps:$4 sm:$0xff]   ;;  %v2820_v22 = vld [vmem:[%s3080_s22 + $0x100] ss:$52 sps:$4 sm:$0xff]  }
  0x4f   : > { %1574 = vmatmul.mubr.bf16.vlgmr.msra.gmra.mrb[16].mxu0 %v2733_v15  ;;  %v2810_v15 = vld [vmem:[%s3080_s22 + $0x15c] ss:$52 sps:$4 sm:$0xff]  }
  0x50   : > { %2472 = vmatpush3.bf16.msra.mxu0 %v2741_v21  ;;  %1639 = vmatmul.mubr.bf16.vlgmr.msra.gmra.mrb[16].mxu1 %v2738_v19  ;;  %v2818_v19 = vld [vmem:[%s3080_s22 + $0x30] ss:$52 sps:$4 sm:$0xff]   ;;  %v2819_v21 = vld [vmem:[%s3080_s22 + $0x98] ss:$52 sps:$4 sm:$0xff]  }
  0x51   : > { %2512 = vmatpush3.bf16.msra.mxu1 %v2743_v23  ;;  %2473 = vmatprep.subr.bf16.mxu0 %v2744_v24  ;;  %v2821_v23 = vld [vmem:[%s3080_s22 + $0x168] ss:$52 sps:$4 sm:$0xff]   ;;  %s2895_s22 = smov 127  }
  0x52   : > { %2513 = vmatprep.subr.bf16.mxu1 %v2746_v26  ;;  %1581 = vmatprep.mubr.bf16.mxu0 %v2747_v27 }
  0x53   : > { %1646 = vmatprep.mubr.bf16.mxu1 %v2752_v31 }
  0x54   : > { %2474 = vmatpush3.bf16.msra.mxu0 %v2745_v25 }
  0x55   : > { %2514 = vmatpush3.bf16.msra.mxu1 %v2749_v28  ;;  %2475 = vmatprep.subr.bf16.mxu0 %v2751_v30 }
  0x56   : > { %2515 = vmatprep.subr.bf16.mxu1 %v2756_v34 }
  0x57   : > { %1582 = vmatmul.mubr.bf16.gmra.mrb[20].mxu0 %v2750_v29 }
  0x58   : > { %2476 = vmatpush3.bf16.msra.mxu0 %v2754_v32  ;;  %1647 = vmatmul.mubr.bf16.gmra.mrb[20].mxu1 %v2755_v33 }
  0x59   : > { %2516 = vmatpush3.bf16.msra.mxu1 %v2757_v35  ;;  %2477 = vmatprep.subr.bf16.mxu0 %v2758_v36 }
  0x5a   : > { %2517 = vmatprep.subr.bf16.mxu1 %v2760_v38  ;;  %1589 = vmatprep.mubr.bf16.mxu0 %v2761_v39 }
  0x5b   : > { %1654 = vmatprep.mubr.bf16.mxu1 %v2766_v43 }
  0x5c   : > { %2478 = vmatpush3.bf16.msra.mxu0 %v2759_v37 }
  0x5d   : > { %2518 = vmatpush3.bf16.msra.mxu1 %v2763_v40  ;;  %2479 = vmatprep.subr.bf16.mxu0 %v2765_v42 }
  0x5e   : > { %2519 = vmatprep.subr.bf16.mxu1 %v2770_v46 }
  0x5f   : > { %1590 = vmatmul.mubr.bf16.gmra.mrb[24].mxu0 %v2764_v41  ;;  %v2892_v41 = vmov 0.0|0.0  }
  0x60   : > { %2480 = vmatpush3.bf16.msra.mxu0 %v2768_v44  ;;  %1655 = vmatmul.mubr.bf16.gmra.mrb[24].mxu1 %v2769_v45 }
  0x61   : > { %2520 = vmatpush3.bf16.msra.mxu1 %v2771_v47  ;;  %2481 = vmatprep.subr.bf16.mxu0 %v2772_v48 }
  0x62   : > { %2521 = vmatprep.subr.bf16.mxu1 %v2774_v50  ;;  %1597 = vmatprep.mubr.bf16.mxu0 %v2775_v51 }
  0x63   : > { %1662 = vmatprep.mubr.bf16.mxu1 %v2780_v55 }
  0x64   : > { %2482 = vmatpush3.bf16.msra.mxu0 %v2773_v49 }
  0x65   : > { %2522 = vmatpush3.bf16.msra.mxu1 %v2777_v52  ;;  %2483 = vmatprep.subr.bf16.mxu0 %v2779_v54  ;;  %v2894_v52 = vmov 0.0  }
  0x66   : > { %2523 = vmatprep.subr.bf16.mxu1 %v2784_v58 }
  0x67   : > { %1598 = vmatmul.mubr.bf16.gmra.mrb[28].mxu0 %v2778_v53 }
  0x68   : > { %2484 = vmatpush3.bf16.msra.mxu0 %v2782_v56  ;;  %1663 = vmatmul.mubr.bf16.gmra.mrb[28].mxu1 %v2783_v57 }
  0x69   : > { %2524 = vmatpush3.bf16.msra.mxu1 %v2785_v59  ;;  %2485 = vmatprep.subr.bf16.mxu0 %v2786_v60 }
  0x6a   : > { %2525 = vmatprep.subr.bf16.mxu1 %v2788_v62  ;;  %1703 = vmatprep.mubr.bf16.mxu0 %v2791_v0 }
  0x6b   : > { %1768 = vmatprep.mubr.bf16.mxu1 %v2795_v3 }
  0x6c   : > { %2486 = vmatpush3.bf16.msra.mxu0 %v2787_v61 }
  0x6d   : > { %2526 = vmatpush3.bf16.msra.mxu1 %v2792_v1  ;;  %2565 = vmatprep.subr.bf16.mxu0 %v2805_v7 }
  0x6e   : > { %2595 = vmatprep.subr.bf16.mxu1 %v2892_v41 }
  0x6f   : > { %1704 = vmatmul.mubr.bf16.vlgmr.msra.gmra.mrb[32].mxu0 %v2789_v63 }
  0x70   : > { %1711 = vmatprep.mubr.bf16.mxu0 %v2796_v4  ;;  %1769 = vmatmul.mubr.bf16.vlgmr.msra.gmra.mrb[32].mxu1 %v2793_v2 }
  0x71   : > { %1776 = vmatprep.mubr.bf16.mxu1 %v2799_v5  ;;  %2566 = vmatpush3.bf16.msra.mxu0 %v2805_v7 }
  0x72   : > { %2567 = vmatprep.subr.bf16.mxu0 %v2809_v10 }
  0x75   : > { %2568 = vmatpush3.bf16.msra.mxu0 %v2809_v10 }
  0x76   : > { %2569 = vmatprep.subr.bf16.mxu0 %v2813_v12 }
  0x77   : > { %1712 = vmatmul.mubr.bf16.gmra.mrb[36].mxu0 %v2798_v6 }
  0x78   : > { %1719 = vmatprep.mubr.bf16.mxu0 %v2802_v8  ;;  %1777 = vmatmul.mubr.bf16.gmra.mrb[36].mxu1 %v2801_v9 }
  0x79   : > { %1784 = vmatprep.mubr.bf16.mxu1 %v2806_v11  ;;  %2570 = vmatpush3.bf16.msra.mxu0 %v2813_v12 }
  0x7a   : > { %2571 = vmatprep.subr.bf16.mxu0 %v2817_v14 }
  0x7d   : > { %2572 = vmatpush3.bf16.msra.mxu0 %v2817_v14 }
  0x7f   : > { %1720 = vmatmul.mubr.bf16.gmra.mrb[40].mxu0 %v2804_v13 }
  0x80   : > { %1727 = vmatprep.mubr.bf16.mxu0 %v2810_v15  ;;  %1785 = vmatmul.mubr.bf16.gmra.mrb[40].mxu1 %v2808_v16 }
  0x81   : > { %1792 = vmatprep.mubr.bf16.mxu1 %v2814_v17 }
  0x87   : > { %1728 = vmatmul.mubr.bf16.gmra.mrb[44].mxu0 %v2812_v18 }
  0x88   : > { %2573 = vmatprep.mubr.msk.bf16.mxu0 %vm1398_vm0, %v2818_v19  ;;  %1793 = vmatmul.mubr.bf16.gmra.mrb[44].mxu1 %v2816_v20 }
  0x89   : > { %2585 = vmatprep.mubr.msk.f32.mxu1 %vm2893_vm1, %v2894_v52 }
  0x8f   : > { %2574 = vmatmul.mubr.msk.bf16.vlgmr.msra.gmra.mrb[48].mxu0 %vm1398_vm0, %v2819_v21 }
  0x90   : > { %2577 = vmatprep.mubr.msk.bf16.mxu0 %vm1398_vm0, %v2820_v22 }
  0x97   : > { %2578 = vmatmul.mubr.msk.bf16.gmra.mrb[52].mxu0 %vm1398_vm0, %v2821_v23 }
 0x102   : > { %v2327_v24 = vpop.f32.mrb[0].mxu0 }
 0x103   : > { %v2367_v25 = vpop.f32.mrb[0].mxu1  ;;  %v2328_v26 = vpop.f32.mrb[1].mxu0 }
 0x104   : > { %v2329_v27 = vadd.f32 %v2328_v26, %v2327_v24  ;;  %v2368_v28 = vpop.f32.mrb[1].mxu1  ;;  %v2330_v29 = vpop.f32.mrb[2].mxu0 }
 0x105   : > { %v2369_v30 = vadd.f32 %v2368_v28, %v2367_v25  ;;  %v2370_v31 = vpop.f32.mrb[2].mxu1  ;;  %v2331_v32 = vpop.f32.mrb[3].mxu0 }
 0x106   : > { %v2332_v33 = vadd.f32 %v2331_v32, %v2330_v29  ;;  %v2371_v34 = vpop.f32.mrb[3].mxu1 }
 0x107   : > { %v1511_v35 = vadd.f32 %v2369_v30, %v2329_v27  ;;  %v2372_v36 = vadd.f32 %v2371_v34, %v2370_v31 }
 0x109   : > { %v1514_v37 = vadd.f32 %v2372_v36, %v2332_v33 }
 0x10a   : > { %v2333_v38 = vpop.f32.mrb[4].mxu0 }
 0x10b   : > { %v2373_v39 = vpop.f32.mrb[4].mxu1  ;;  %v2334_v40 = vpop.f32.mrb[5].mxu0 }
 0x10c   : > { %v2335_v42 = vadd.f32 %v2334_v40, %v2333_v38  ;;  %v2374_v43 = vpop.f32.mrb[5].mxu1  ;;  %v2336_v44 = vpop.f32.mrb[6].mxu0 }
 0x10d   : > { %v2375_v45 = vadd.f32 %v2374_v43, %v2373_v39  ;;  %v2376_v46 = vpop.f32.mrb[6].mxu1  ;;  %v2337_v47 = vpop.f32.mrb[7].mxu0 }
 0x10e   : > { %v2338_v48 = vadd.f32 %v2337_v47, %v2336_v44  ;;  %v2377_v49 = vpop.f32.mrb[7].mxu1 }
 0x10f   : > { %v1519_v50 = vadd.f32 %v2375_v45, %v2335_v42  ;;  %v2378_v51 = vadd.f32 %v2377_v49, %v2376_v46 }
 0x111   : > { %v1522_v53 = vadd.f32 %v2378_v51, %v2338_v48 }
 0x112   : > { %v2339_v54 = vpop.f32.mrb[8].mxu0 }
 0x113   : > { %v2379_v55 = vpop.f32.mrb[8].mxu1  ;;  %v2340_v56 = vpop.f32.mrb[9].mxu0 }
 0x114   : > { %v2341_v57 = vadd.f32 %v2340_v56, %v2339_v54  ;;  %v2380_v58 = vpop.f32.mrb[9].mxu1  ;;  %v2342_v59 = vpop.f32.mrb[10].mxu0 }
 0x115   : > { %v2381_v60 = vadd.f32 %v2380_v58, %v2379_v55  ;;  %v2382_v61 = vpop.f32.mrb[10].mxu1  ;;  %v2343_v62 = vpop.f32.mrb[11].mxu0 }
 0x116   : > { %v2344_v63 = vadd.f32 %v2343_v62, %v2342_v59  ;;  %v2383_v0 = vpop.f32.mrb[11].mxu1 }
 0x117   : > { %v1527_v1 = vadd.f32 %v2381_v60, %v2341_v57  ;;  %v2384_v2 = vadd.f32 %v2383_v0, %v2382_v61 }
 0x119   : > { %v1530_v3 = vadd.f32 %v2384_v2, %v2344_v63 }
 0x11a   : > { %v2345_v4 = vpop.f32.mrb[12].mxu0 }
 0x11b   : > { %v2385_v5 = vpop.f32.mrb[12].mxu1  ;;  %v2346_v6 = vpop.f32.mrb[13].mxu0 }
 0x11c   : > { %v2386_v7 = vpop.f32.mrb[13].mxu1  ;;  %v2347_v8 = vadd.f32 %v2346_v6, %v2345_v4  ;;  %v2348_v10 = vpop.f32.mrb[14].mxu0 }
 0x11d   : > { %v2387_v9 = vadd.f32 %v2386_v7, %v2385_v5  ;;  %v2388_v11 = vpop.f32.mrb[14].mxu1  ;;  %v2349_v12 = vpop.f32.mrb[15].mxu0 }
 0x11e   : > { %v2389_v13 = vpop.f32.mrb[15].mxu1  ;;  %v2350_v15 = vadd.f32 %v2349_v12, %v2348_v10 }
 0x11f   : > { %v1535_v14 = vadd.f32 %v2387_v9, %v2347_v8  ;;  %v2390_v16 = vadd.f32 %v2389_v13, %v2388_v11 }
 0x121   : > { %v1538_v17 = vadd.f32 %v2390_v16, %v2350_v15 }
 0x122   : > { %v2407_v18 = vpop.f32.mrb[16].mxu0 }
 0x123   : > { %v2408_v19 = vpop.f32.mrb[17].mxu0  ;;  %v2447_v24 = vpop.f32.mrb[16].mxu1 }
 0x124   : > { %v2409_v20 = vadd.f32 %v2408_v19, %v2407_v18  ;;  %v2410_v21 = vpop.f32.mrb[18].mxu0  ;;  %v2448_v26 = vpop.f32.mrb[17].mxu1 }
 0x125   : > { %v2411_v22 = vpop.f32.mrb[19].mxu0  ;;  %v2449_v28 = vadd.f32 %v2448_v26, %v2447_v24  ;;  %v2450_v29 = vpop.f32.mrb[18].mxu1 }
 0x126   : > { %v1576_v23 = vadd.f32 %v2409_v20, %v1511_v35  ;;  %v2412_v25 = vadd.f32 %v2411_v22, %v2410_v21  ;;  %v2451_v30 = vpop.f32.mrb[19].mxu1 }
 0x127   : > { %v2452_v32 = vadd.f32 %v2451_v30, %v2450_v29 }
 0x128   : > { %v1579_v27 = vadd.f32 %v2412_v25, %v1514_v37  ;;  %v1641_v31 = vadd.f32 %v2449_v28, %v1576_v23 }
 0x12a   : > { %v1644_v33 = vadd.f32 %v2452_v32, %v1579_v27  ;;  %v2413_v34 = vpop.f32.mrb[20].mxu0 }
 0x12b   : > { %v2414_v36 = vpop.f32.mrb[21].mxu0  ;;  %v2453_v40 = vpop.f32.mrb[20].mxu1 }
 0x12c   : > { %v2415_v38 = vadd.f32 %v2414_v36, %v2413_v34  ;;  %v2416_v39 = vpop.f32.mrb[22].mxu0  ;;  %v2454_v45 = vpop.f32.mrb[21].mxu1 }
 0x12d   : > { %v2417_v42 = vpop.f32.mrb[23].mxu0  ;;  %v2455_v35 = vadd.f32 %v2454_v45, %v2453_v40  ;;  %v2456_v46 = vpop.f32.mrb[22].mxu1 }
 0x12e   : > { %v1584_v43 = vadd.f32 %v2415_v38, %v1519_v50  ;;  %v2418_v44 = vadd.f32 %v2417_v42, %v2416_v39  ;;  %v2457_v48 = vpop.f32.mrb[23].mxu1 }
 0x12f   : > { %v2458_v49 = vadd.f32 %v2457_v48, %v2456_v46 }
 0x130   : > { %v1587_v47 = vadd.f32 %v2418_v44, %v1522_v53  ;;  %v1649_v37 = vadd.f32 %v2455_v35, %v1584_v43 }
 0x132   : > { %v1652_v51 = vadd.f32 %v2458_v49, %v1587_v47  ;;  %v2419_v54 = vpop.f32.mrb[24].mxu0 }
 0x133   : > { %v2420_v55 = vpop.f32.mrb[25].mxu0  ;;  %v2459_v58 = vpop.f32.mrb[24].mxu1 }
 0x134   : > { %v2421_v56 = vadd.f32 %v2420_v55, %v2419_v54  ;;  %v2422_v57 = vpop.f32.mrb[26].mxu0  ;;  %v2460_v62 = vpop.f32.mrb[25].mxu1 }
 0x135   : > { %v2423_v59 = vpop.f32.mrb[27].mxu0  ;;  %v2461_v63 = vadd.f32 %v2460_v62, %v2459_v58  ;;  %v2462_v50 = vpop.f32.mrb[26].mxu1 }
 0x136   : > { %v1592_v60 = vadd.f32 %v2421_v56, %v1527_v1  ;;  %v2424_v61 = vadd.f32 %v2423_v59, %v2422_v57  ;;  %v2463_v2 = vpop.f32.mrb[27].mxu1 }
 0x137   : > { %v2464_v5 = vadd.f32 %v2463_v2, %v2462_v50 }
 0x138   : > { %v1595_v0 = vadd.f32 %v2424_v61, %v1530_v3  ;;  %v1657_v4 = vadd.f32 %v2461_v63, %v1592_v60 }
 0x13a   : > { %v1660_v53 = vadd.f32 %v2464_v5, %v1595_v0  ;;  %v2425_v6 = vpop.f32.mrb[28].mxu0 }
 0x13b   : > { %v2426_v7 = vpop.f32.mrb[29].mxu0  ;;  %v2465_v12 = vpop.f32.mrb[28].mxu1 }
 0x13c   : > { %v2427_v8 = vadd.f32 %v2426_v7, %v2425_v6  ;;  %v2428_v9 = vpop.f32.mrb[30].mxu0  ;;  %v2466_v15 = vpop.f32.mrb[29].mxu1 }
 0x13d   : > { %v2429_v10 = vpop.f32.mrb[31].mxu0  ;;  %v2467_v1 = vadd.f32 %v2466_v15, %v2465_v12  ;;  %v2468_v18 = vpop.f32.mrb[30].mxu1 }
 0x13e   : > { %v1600_v11 = vadd.f32 %v2427_v8, %v1535_v14  ;;  %v2430_v13 = vadd.f32 %v2429_v10, %v2428_v9  ;;  %v2469_v19 = vpop.f32.mrb[31].mxu1 }
 0x13f   : > { %v2470_v21 = vadd.f32 %v2469_v19, %v2468_v18 }
 0x140   : > { %v1603_v16 = vadd.f32 %v2430_v13, %v1538_v17  ;;  %v1665_v20 = vadd.f32 %v2467_v1, %v1600_v11 }
 0x142   : > { %v1668_v3 = vadd.f32 %v2470_v21, %v1603_v16  ;;  %v2487_v22 = vpop.f32.mrb[32].mxu0 }
 0x143   : > { %v2488_v23 = vpop.f32.mrb[33].mxu0  ;;  %v2527_v26 = vpop.f32.mrb[32].mxu1 }
 0x144   : > { %v2489_v24 = vadd.f32 %v2488_v23, %v2487_v22  ;;  %v2490_v25 = vpop.f32.mrb[34].mxu0  ;;  %v2528_v30 = vpop.f32.mrb[33].mxu1 }
 0x145   : > { %v2491_v27 = vpop.f32.mrb[35].mxu0  ;;  %v2529_v14 = vadd.f32 %v2528_v30, %v2527_v26  ;;  %v2530_v32 = vpop.f32.mrb[34].mxu1 }
 0x146   : > { %v1706_v28 = vadd.f32 %v2489_v24, %v1641_v31  ;;  %v2492_v29 = vadd.f32 %v2491_v27, %v2490_v25  ;;  %v2531_v36 = vpop.f32.mrb[35].mxu1 }
 0x147   : > { %v2532_v17 = vadd.f32 %v2531_v36, %v2530_v32 }
 0x148   : > { %v1709_v34 = vadd.f32 %v2492_v29, %v1644_v33  ;;  %v1771_v38 = vadd.f32 %v2529_v14, %v1706_v28 }
 0x14a   : > { %v2493_v39 = vpop.f32.mrb[36].mxu0  ;;  %v1774_v42 = vadd.f32 %v2532_v17, %v1709_v34 }
 0x14b   : > { %v2494_v40 = vpop.f32.mrb[37].mxu0  ;;  %v2533_v45 = vpop.f32.mrb[36].mxu1 }
 0x14c   : > { %v2495_v43 = vadd.f32 %v2494_v40, %v2493_v39  ;;  %v2496_v44 = vpop.f32.mrb[38].mxu0  ;;  %v2534_v48 = vpop.f32.mrb[37].mxu1 }
 0x14d   : > { %v2497_v35 = vpop.f32.mrb[39].mxu0  ;;  %v2535_v49 = vadd.f32 %v2534_v48, %v2533_v45  ;;  %v2536_v31 = vpop.f32.mrb[38].mxu1 }
 0x14e   : > { %v1714_v46 = vadd.f32 %v2495_v43, %v1649_v37  ;;  %v2498_v47 = vadd.f32 %v2497_v35, %v2496_v44  ;;  %v2537_v55 = vpop.f32.mrb[39].mxu1 }
 0x14f   : > { %v2538_v56 = vadd.f32 %v2537_v55, %v2536_v31 }
 0x150   : > { %v1717_v54 = vadd.f32 %v2498_v47, %v1652_v51  ;;  %v1779_v57 = vadd.f32 %v2535_v49, %v1714_v46  ;;  %v2305_v47 = vld [vmem:[%s3420_s2] ss:$0 sm:$0xff] }
 0x152   : > { %v2499_v33 = vpop.f32.mrb[40].mxu0  ;;  %v1782_v59 = vadd.f32 %v2538_v56, %v1717_v54  ;;  %v1962_v56 = vld [vmem:[%s3422_s4] sm:$0xff] }
 0x153   : > { %v2500_v58 = vpop.f32.mrb[41].mxu0  ;;  %v2539_v62 = vpop.f32.mrb[40].mxu1 }
 0x154   : > { %v2501_v60 = vadd.f32 %v2500_v58, %v2499_v33  ;;  %v2502_v61 = vpop.f32.mrb[42].mxu0  ;;  %v2540_v2 = vpop.f32.mrb[41].mxu1  ;;  %v1963_v33 = vld [vmem:[%s3422_s4 + $0x8] sm:$0xff] }
 0x155   : > { %v2503_v63 = vpop.f32.mrb[43].mxu0  ;;  %v2541_v5 = vadd.f32 %v2540_v2, %v2539_v62  ;;  %v2542_v37 = vpop.f32.mrb[42].mxu1  ;;  %v2046_v2 = vlaneseq }
 0x156   : > { %v1722_v50 = vadd.f32 %v2501_v60, %v1657_v4  ;;  %v2504_v0 = vadd.f32 %v2503_v63, %v2502_v61  ;;  %v2543_v7 = vpop.f32.mrb[43].mxu1 }
 0x157   : > { %v2544_v8 = vadd.f32 %v2543_v7, %v2542_v37  ;;  %v2040_v37 = vld [vmem:[%s3424_s6] sm:$0x1] }
 0x158   : > { %v1725_v6 = vadd.f32 %v2504_v0, %v1660_v53  ;;  %v1787_v9 = vadd.f32 %v2541_v5, %v1722_v50  ;;  %v1883_v0 = vld [vmem:[%s3423_s5] sm:$0x1]  ;;  %v2047_v5 = vshrl.u32 %v2046_v2, 7 }
 0x15a   : > { %v2505_v51 = vpop.f32.mrb[44].mxu0  ;;  %v1790_v11 = vadd.f32 %v2544_v8, %v1725_v6  ;;  %v2048_v6 = vsub.s32 0, %v2047_v5 }
 0x15b   : > { %v2506_v10 = vpop.f32.mrb[45].mxu0  ;;  %v2545_v15 = vpop.f32.mrb[44].mxu1 }
 0x15c   : > { %v2507_v12 = vadd.f32 %v2506_v10, %v2505_v51  ;;  %v2508_v13 = vpop.f32.mrb[46].mxu0  ;;  %v2546_v19 = vpop.f32.mrb[45].mxu1  ;;  %v2049_v7 = vrot.slane %v2040_v37, %v2048_v6 }
 0x15d   : > { %v2509_v16 = vpop.f32.mrb[47].mxu0  ;;  %v2547_v21 = vadd.f32 %v2546_v19, %v2545_v15  ;;  %v2548_v4 = vpop.f32.mrb[46].mxu1 }
 0x15e   : > { %v1730_v1 = vadd.f32 %v2507_v12, %v1665_v20  ;;  %v2510_v18 = vadd.f32 %v2509_v16, %v2508_v13  ;;  %v2549_v23 = vpop.f32.mrb[47].mxu1  ;;  %2050 = vrot.lane.b32.xlu1 %v2049_v7, %s2895_s22 }
 0x15f   : > { %v2550_v24 = vadd.f32 %v2549_v23, %v2548_v4 }
 0x160   : > { %v1733_v22 = vadd.f32 %v2510_v18, %v1668_v3  ;;  %v1795_v25 = vadd.f32 %v2547_v21, %v1730_v1 }
 0x162   : > { %v2575_v53 = vpop.f32.mrb[48].mxu0  ;;  %v1798_v28 = vadd.f32 %v2550_v24, %v1733_v22 }
 0x163   : > { %v1844_v26 = vadd.f32 %v2575_v53, %v1779_v57  ;;  %v1835_v27 = vpop.f32.mrb[49].mxu0  ;;  %v1885_v57 = vld [vmem:[%s3421_s3 + $0x8] sm:$0xff] }
 0x164   : > { %v1836_v29 = vadd.f32 %v1835_v27, %v1771_v38  ;;  %v2576_v30 = vpop.f32.mrb[50].mxu0 }
 0x165   : > { %v1847_v14 = vadd.f32 %v2576_v30, %v1782_v59  ;;  %v1838_v32 = vpop.f32.mrb[51].mxu0 }
 0x166   : > { %v1866_v34 = vmax.f32 %v1836_v29, %v1844_v26  ;;  %v1839_v36 = vadd.f32 %v1838_v32, %v1774_v42  ;;  %v1884_v42 = vld [vmem:[%s3421_s3] sm:$0xff] }
 0x168   : > { %v1867_v17 = vmax.f32 %v1839_v36, %v1847_v14 }
 0x16a   : > { %v2579_v20 = vpop.f32.mrb[52].mxu0 }
 0x16b   : > { %v1860_v39 = vadd.f32 %v2579_v20, %v1795_v25  ;;  %v1851_v40 = vpop.f32.mrb[53].mxu0 }
 0x16c   : > { %v1852_v43 = vadd.f32 %v1851_v40, %v1787_v9  ;;  %v2580_v44 = vpop.f32.mrb[54].mxu0 }
 0x16d   : > { %v1863_v3 = vadd.f32 %v2580_v44, %v1798_v28  ;;  %v1854_v45 = vpop.f32.mrb[55].mxu0 }
 0x16e   : > { %v1868_v35 = vmax.f32 %v1852_v43, %v1860_v39  ;;  %v1855_v46 = vadd.f32 %v1854_v45, %v1790_v11 }
 0x170   : > { %v1870_v38 = vmax.f32 %v1866_v34, %v1868_v35  ;;  %v1869_v48 = vmax.f32 %v1855_v46, %v1863_v3 }
 0x172   : > { %v1879_v49 = vadd.f32 %v2305_v47, %v1870_v38  ;;  %v1871_v31 = vmax.f32 %v1867_v17, %v1869_v48 }
 0x174   : > { %v1881_v54 = vmax.f32 %v1879_v49, 0.0  ;;  %v1880_v55 = vadd.f32 %v2305_v47, %v1871_v31 }
 0x176   : > { %v1882_v58 = vmax.f32 %v1880_v55, 0.0  ;;  %v1886_v59 = vmul.f32 %v1884_v42, %v1881_v54  ;;  %v1964_v60 = vmul.f32 %v1962_v56, %v1881_v54 }
 0x178   : > { %v1887_v61 = vmul.f32 %v1885_v57, %v1882_v58  ;;  %v1965_v62 = vmul.f32 %v1963_v33, %v1882_v58 }
 0x17a   : > { %v2596_v63 = vpack.c.bf16 %v1887_v61, %v1886_v59  ;;  %v2599_v50 = vpack.c.bf16 %v1965_v62, %v1964_v60 }
 0x17c   : > { %2597 = vmatpush3.bf16.msra.mxu1 %v2596_v63 }
 0x17d   : > { %2598 = vmatprep.subr.bf16.mxu1 %v2892_v41 }
 0x17f   : > { %2586 = vmatmul.mubr.msk.f32.vlgmr.msra.gmra.mrb[48].mxu1 %vm1888_vm2, %v1883_v0 }
 0x180   : > { %2600 = vmatpush3.bf16.msra.mxu1 %v2599_v50  ;;  %2592 = vmatprep.mubr.msk.f32.mxu1 %vm2893_vm1, %v2894_v52 }
 0x183   : > { %2593 = vmatmul.mubr.msk.f32.vlgmr.msra.gmra.mrb[50].mxu1 %vm1888_vm2, %v1883_v0 }
 0x1d0   : > { %v2051_v12 = vpop.permute.xlu1 %2050 }
 0x252   : > { %v1958_v8 = vpop.f32.mrb[48].mxu1 }
 0x253   : > { %v2037_v9 = vsel %vm2036_vm3, %v1958_v8, 0.0  ;;  %v2587_v41 = vpop.f32.mrb[49].mxu1 }
 0x254   : > { %2038 = vadd.xlane.f32.xlu0 %v2037_v9 }
 0x256   : > { %v2032_v51 = vpop.f32.mrb[50].mxu1 }
 0x257   : > { %v2042_v10 = vsel %vm2036_vm3, %v2032_v51, 0.0  ;;  %v2594_v11 = vpop.f32.mrb[51].mxu1 }
 0x258   : > { %2043 = vadd.xlane.f32.xlu0 %v2042_v10 }
 0x2e1   : > { %v2039_v52 = vpop.xlane.xlu0 %2038 }
 0x2e2   : > { %v2041_v15 = vadd.f32 %v2040_v37, %v2039_v52 }
 0x2e5   : > { %v2044_v13 = vpop.xlane.xlu0 %2043 }
 0x2e6   : > { %v2053_v16 = vadd.f32 %v2051_v12, %v2044_v13 }
 0x2e8   : > { %v2054_v1 = vmax.f32 %v2041_v15, %v2053_v16 }
 0x2ea   : > { %v2055_v18 = vsub.f32 %v2041_v15, %v2054_v1  ;;  %v2058_v19 = vsub.f32 %v2053_v16, %v2054_v1 }
 0x2ec   : > { %v2056_v21 = vmul.f32 1.442695, %v2055_v18  ;;  %v2059_v4 = vmul.f32 1.442695, %v2058_v19 }
 0x2ee   : > { %2822 = vpow2.f32 %v2056_v21 }
 0x2ef   : > { %2824 = vpow2.f32 %v2059_v4 }
 0x2f8   : > { %v2823_v22 = vpop.eup %2822 }
 0x2f9   : > { %v2825_v23 = vpop.eup %2824 }
 0x2fa   : > { %v2061_v24 = vadd.f32 %v2825_v23, %v2823_v22 }
 0x2fc   : > { %2826 = vlog2.f32 %v2061_v24 }
 0x306   : > { %v2827_v25 = vpop.eup %2826 }
 0x307   : > { %v2063_v53 = vmul.f32 0.6931472, %v2827_v25 }
 0x309   : > { %v2064_v26 = vadd.f32 %v2063_v53, %v2054_v1 }
 0x30b   : > { %v2068_v27 = vsub.f32 %v2053_v16, %v2064_v26  ;;  %v2065_v28 = vsub.f32 %v2041_v15, %v2064_v26 }
 0x30d   : > { %2070 = vrot.lane.b32.xlu1 %v2068_v27, %s2896_s15  ;;  %2067 = vst.msk [vmem:[%s273_s21] sm:$0x1] %vm2066_vm4, %v2065_v28 }
 0x37f   : > { %v2071_v29 = vpop.permute.xlu1 %2070 }
 0x380   : > { %2074 = vst.msk [vmem:[%s273_s21] sm:$0x1] %vm2073_vm5, %v2071_v29 }
 0x381   : > { %2841 = shalt.err (!%p2838_p3)
}
 0x382   : > { %s2842_s19 = scalar_lea.hbm %s3376_s8, 16  ;;  %s2846_s15 = scalar_lea.hbm %s3425_s7, 32 }
 0x383   : > { %p2843_p4 = scmp.ne.s32.totalorder %s3376_s8, %s2842_s19  ;;  %p2847_p9 = scmp.lt.u32.totalorder %s3376_s8, %s3425_s7 }
 0x384   : > { %p2848_p10 = scmp.lt.u32.totalorder %s2846_s15, %s2842_s19  ;;  %p2850_p12 = scmp.lt.u32.totalorder %s2842_s19, %s3376_s8 }
 0x385   : > { %p2844_p7 = pnand %p2843_p4, %p2976_p5 }
 0x386   : > { %p2849_p11 = por %p2848_p10, %p2847_p9 }
 0x387   : > { %p2845_p8 = pneg %p2844_p7 }
 0x388   : > { %p2851_p13 = por %p2850_p12, %p2849_p11 }
 0x38a   : > { %p2852_p0 = pnand %p2851_p13, %p2845_p8 }
 0x38c   : > { %2855 = shalt.err (!%p2852_p0)
}
 0x38d   : > { %2602 = dma.vmem_to_hbm [thread:$0]  (%p2976_p5), %s3378_s29, 16, %s3376_s8, %s2076_s14  }
 0x38e PF: > { %p2608_p1 = scmp.ge.s32.totalorder %s2890_s27, 2  ;;  %s2100_s9 = sand.u32 1, %s2878_s24  }
 0x38f   : > { %s2101_s13 = scalar_lea.sflag [#allocation3], %s2100_s9 }
 0x390   : > { %p2605_p2 = pnand %p2608_p1, %p2980_p6 }
 0x392   : > { %2873 = dma.done.wait (!%p2605_p2), %s2101_s13, 16  }
 0x393   : > { %2875 = vsyncadd (!%p2605_p2), %s2101_s13, 4294967280  ;;  %p17_p3 = scmp.ge.s32.totalorder %s2963_s30, 4   ;;  %s3428_s24 = smov %s2882_s25 }
 0x394   : > { %s3429_s25 = smov %s2886_s26  ;;  %s3430_s26 = smov %s2974_s10 }
 0x395   : > { %s3431_s27 = smov %s2963_s30  ;;  %19 = sbr.rel (!%p17_p3) target bundleno = 3 (0x3), region = 83 }
 0x39c   :  { %2105 = vsyncpa [#allocation3], 1 }
 0x39d   :  { %2107 = vsyncpa [#allocation3 + $0x1], 1 }

</bundles_post_ra>
